<compile_context>
chip_gen: v6e
topology: v6e:2x2x1
jax: 0.10.0
libtpu: 0.0.40
codegen_flags: <defaults>
</compile_context>

<pallas_src>
import functools
import math

import jax
import jax.numpy as jnp
from jax.experimental import pallas as pl
from jax.experimental.pallas import tpu as pltpu


# ----------------------------------------------------------------------------
# In-kernel helpers
# ----------------------------------------------------------------------------

def _layernorm(x, g, b, eps=1e-5):
    mu = jnp.mean(x, axis=-1, keepdims=True)
    var = jnp.mean((x - mu) ** 2, axis=-1, keepdims=True)
    return (x - mu) * jax.lax.rsqrt(var + eps) * g + b


def _bf16_dot(a, w):
    """bf16-operand MXU matmul with f32 accumulation."""
    return jnp.dot(a.astype(jnp.bfloat16), w.astype(jnp.bfloat16),
                   preferred_element_type=jnp.float32)


def _transformer_block_body(x, ln1g_ref, ln1b_ref, wqkv_ref, bqkv_ref,
                            wo_ref, bo_ref, ln2g_ref, ln2b_ref,
                            w1_ref, b1_ref, w2_ref, b2_ref, num_heads):
    """Pre-norm transformer block on a (S, D) f32 activation. Returns (S, D)."""
    S, D = x.shape
    Dh = D // num_heads
    scale = 1.0 / math.sqrt(Dh)

    # ---- attention sub-block (pre-norm) ----
    h = _layernorm(x,
                   ln1g_ref[0].astype(jnp.float32),
                   ln1b_ref[0].astype(jnp.float32))
    qkv = _bf16_dot(h, wqkv_ref[0]) + bqkv_ref[0].astype(jnp.float32)  # (S, 3D)
    q = qkv[:, :D]
    k = qkv[:, D:2 * D]
    v = qkv[:, 2 * D:]

    head_outs = []
    for hh in range(num_heads):
        lo, hi = hh * Dh, (hh + 1) * Dh
        qh = q[:, lo:hi] * scale                                       # (S, Dh)
        kh = k[:, lo:hi]
        vh = v[:, lo:hi]
        s = jnp.dot(qh.astype(jnp.bfloat16), kh.astype(jnp.bfloat16).T,
                    preferred_element_type=jnp.float32)                # (S, S)
        m = jnp.max(s, axis=-1, keepdims=True)
        p = jnp.exp(s - m)
        denom = jnp.sum(p, axis=-1, keepdims=True)
        oh = jnp.dot(p.astype(jnp.bfloat16), vh.astype(jnp.bfloat16),
                     preferred_element_type=jnp.float32)               # (S, Dh)
        head_outs.append(oh * pl.reciprocal(denom, approx=True))
    attn = jnp.concatenate(head_outs, axis=-1)                         # (S, D)

    proj = _bf16_dot(attn, wo_ref[0]) + bo_ref[0].astype(jnp.float32)
    x1 = x + proj

    # ---- MLP sub-block (pre-norm) ----
    h2 = _layernorm(x1,
                    ln2g_ref[0].astype(jnp.float32),
                    ln2b_ref[0].astype(jnp.float32))
    m1 = _bf16_dot(h2, w1_ref[0]) + b1_ref[0].astype(jnp.float32)
    m1 = jax.nn.gelu(m1)   # tanh approx; TransformerBlock not in reference spec
    m2 = _bf16_dot(m1, w2_ref[0]) + b2_ref[0].astype(jnp.float32)
    return x1 + m2


# ----------------------------------------------------------------------------
# Fully fused encoder kernel: stem + pos add + all transformer blocks
# grid = (batch, layer); activation carried in VMEM scratch across layers.
# ----------------------------------------------------------------------------

def _encoder_kernel(x_ref, stem_w_ref, stem_b_ref, pos_ref,
                    ln1g_ref, ln1b_ref, wqkv_ref, bqkv_ref, wo_ref, bo_ref,
                    ln2g_ref, ln2b_ref, w1_ref, b1_ref, w2_ref, b2_ref,
                    o_ref, carry_ref, *, num_heads):
    layer = pl.program_id(1)
    num_layers = pl.num_programs(1)

    @pl.when(layer == 0)
    def _():
        y = _bf16_dot(x_ref[0], stem_w_ref[...])
        y = (y + stem_b_ref[...].astype(jnp.float32)
               + pos_ref[...].astype(jnp.float32))
        carry_ref[...] = y

    carry_ref[...] = _transformer_block_body(
        carry_ref[...], ln1g_ref, ln1b_ref, wqkv_ref, bqkv_ref, wo_ref, bo_ref,
        ln2g_ref, ln2b_ref, w1_ref, b1_ref, w2_ref, b2_ref, num_heads)

    @pl.when(layer == num_layers - 1)
    def _():
        o_ref[0] = carry_ref[...].astype(o_ref.dtype)


def encoder_forward(p, x, pos_idx, num_heads):
    B, S, C = x.shape
    D = p["stem_w"].shape[1]
    blocks = p["blocks"]
    L = blocks["wqkv"].shape[0]
    hidden = blocks["w1"].shape[2]
    pos = p["pos_emb"][pos_idx]                      # (S, D) embedding lookup (glue)

    def const(shape):
        return pl.BlockSpec(shape, lambda b, l: (0,) * len(shape))

    def layer(shape):
        return pl.BlockSpec((1,) + shape, lambda b, l: (l,) + (0,) * len(shape))

    flops_layer = (2 * S * D * 3 * D + 4 * S * S * D + 2 * S * D * D
                   + 4 * S * D * hidden)
    weight_bytes_layer = ((D * 3 * D + D * D + 2 * D * hidden) * 2
                          + (3 * D + 2 * D + hidden + 4 * D) * 4)
    cost = pl.CostEstimate(
        flops=int(B * (2 * S * C * D + L * flops_layer)),
        transcendentals=int(B * L * (num_heads * S * S + S * hidden + 2 * S)),
        bytes_accessed=int(B * S * (C + D) * 4 + L * weight_bytes_layer
                           + C * D * 2 + S * D * 4),
    )

    return pl.pallas_call(
        functools.partial(_encoder_kernel, num_heads=num_heads),
        out_shape=jax.ShapeDtypeStruct((B, S, D), x.dtype),
        grid=(B, L),
        in_specs=[
            pl.BlockSpec((1, S, C), lambda b, l: (b, 0, 0)),
            const((C, D)), const((1, D)), const((S, D)),      # stem w, b, pos
            layer((1, D)), layer((1, D)),                     # ln1 g, b
            layer((D, 3 * D)), layer((1, 3 * D)),             # wqkv, bqkv
            layer((D, D)), layer((1, D)),                     # wo, bo
            layer((1, D)), layer((1, D)),                     # ln2 g, b
            layer((D, hidden)), layer((1, hidden)),           # w1, b1
            layer((hidden, D)), layer((1, D)),                # w2, b2
        ],
        out_specs=pl.BlockSpec((1, S, D), lambda b, l: (b, 0, 0)),
        scratch_shapes=[pltpu.VMEM((S, D), jnp.float32)],
        compiler_params=pltpu.CompilerParams(
            dimension_semantics=("parallel", "arbitrary")),
        cost_estimate=cost,
    )(x, p["stem_w"], p["stem_b"], pos,
      blocks["ln1_g"], blocks["ln1_b"],
      blocks["wqkv"], blocks["bqkv"],
      blocks["wo"], blocks["bo"],
      blocks["ln2_g"], blocks["ln2_b"],
      blocks["w1"], blocks["b1"],
      blocks["w2"], blocks["b2"])


# ----------------------------------------------------------------------------
# Fully fused decoder kernel: mask-token concat + pos add + all blocks + proj
# ----------------------------------------------------------------------------

def _decoder_kernel(enc_ref, mask_ref, pos_ref,
                    ln1g_ref, ln1b_ref, wqkv_ref, bqkv_ref, wo_ref, bo_ref,
                    ln2g_ref, ln2b_ref, w1_ref, b1_ref, w2_ref, b2_ref,
                    out_w_ref, out_b_ref,
                    o_ref, carry_ref, *, num_heads):
    layer = pl.program_id(1)
    num_layers = pl.num_programs(1)
    P, D = carry_ref.shape
    S_enc = enc_ref.shape[1]
    num_masked = P - S_enc

    @pl.when(layer == 0)
    def _():
        enc = enc_ref[0].astype(jnp.float32)                         # (S_enc, D)
        msk = jnp.broadcast_to(mask_ref[...].astype(jnp.float32),
                               (num_masked, D))                      # (masked, D)
        act = jnp.concatenate([enc, msk], axis=0)                    # (P, D)
        carry_ref[...] = act + pos_ref[...].astype(jnp.float32)

    carry_ref[...] = _transformer_block_body(
        carry_ref[...], ln1g_ref, ln1b_ref, wqkv_ref, bqkv_ref, wo_ref, bo_ref,
        ln2g_ref, ln2b_ref, w1_ref, b1_ref, w2_ref, b2_ref, num_heads)

    @pl.when(layer == num_layers - 1)
    def _():
        y = _bf16_dot(carry_ref[...], out_w_ref[...])
        y = y + out_b_ref[...].astype(jnp.float32)
        o_ref[0] = y.astype(o_ref.dtype)


def decoder_forward(p, encoder_output, all_positions, num_heads):
    B, S_enc, D = encoder_output.shape
    P = all_positions.shape[0]
    blocks = p["blocks"]
    L = blocks["wqkv"].shape[0]
    hidden = blocks["w1"].shape[2]
    N = p["out_w"].shape[1]
    pos = p["pos_emb"][all_positions]                 # (P, D) embedding lookup (glue)

    def const(shape):
        return pl.BlockSpec(shape, lambda b, l: (0,) * len(shape))

    def layer(shape):
        return pl.BlockSpec((1,) + shape, lambda b, l: (l,) + (0,) * len(shape))

    flops_layer = (2 * P * D * 3 * D + 4 * P * P * D + 2 * P * D * D
                   + 4 * P * D * hidden)
    weight_bytes_layer = ((D * 3 * D + D * D + 2 * D * hidden) * 2
                          + (3 * D + 2 * D + hidden + 4 * D) * 4)
    cost = pl.CostEstimate(
        flops=int(B * (L * flops_layer + 2 * P * D * N)),
        transcendentals=int(B * L * (num_heads * P * P + P * hidden + 2 * P)),
        bytes_accessed=int(B * (S_enc * D + P * N) * 4 + L * weight_bytes_layer
                           + D * N * 2 + P * D * 4),
    )

    return pl.pallas_call(
        functools.partial(_decoder_kernel, num_heads=num_heads),
        out_shape=jax.ShapeDtypeStruct((B, P, N), encoder_output.dtype),
        grid=(B, L),
        in_specs=[
            pl.BlockSpec((1, S_enc, D), lambda b, l: (b, 0, 0)),
            const((1, D)), const((P, D)),                     # mask tok, pos
            layer((1, D)), layer((1, D)),                     # ln1 g, b
            layer((D, 3 * D)), layer((1, 3 * D)),             # wqkv, bqkv
            layer((D, D)), layer((1, D)),                     # wo, bo
            layer((1, D)), layer((1, D)),                     # ln2 g, b
            layer((D, hidden)), layer((1, hidden)),           # w1, b1
            layer((hidden, D)), layer((1, D)),                # w2, b2
            const((D, N)), const((1, N)),                     # out proj
        ],
        out_specs=pl.BlockSpec((1, P, N), lambda b, l: (b, 0, 0)),
        scratch_shapes=[pltpu.VMEM((P, D), jnp.float32)],
        compiler_params=pltpu.CompilerParams(
            dimension_semantics=("parallel", "arbitrary")),
        cost_estimate=cost,
    )(encoder_output, p["mask_emb"], pos,
      blocks["ln1_g"], blocks["ln1_b"],
      blocks["wqkv"], blocks["bqkv"],
      blocks["wo"], blocks["bo"],
      blocks["ln2_g"], blocks["ln2_b"],
      blocks["w1"], blocks["b1"],
      blocks["w2"], blocks["b2"],
      p["out_w"], p["out_b"])


# ----------------------------------------------------------------------------
# Model (glue in plain JAX, hot paths in Pallas)
# ----------------------------------------------------------------------------

@functools.partial(jax.jit,
                   static_argnames=("enc_heads", "dec_heads", "masking_ratio"))
def masked_autoencoder_forward(params, inp_batch, perm_key,
                               enc_heads, dec_heads, masking_ratio=0.75):
    B, P, C = inp_batch.shape
    first_masked_idx = int(P * (1 - masking_ratio))

    # scrambleBatch
    new_positions = jax.random.permutation(perm_key, P)
    scrambled = inp_batch[:, new_positions, :]
    inv_permutation = jnp.argsort(new_positions)

    unmasked = scrambled[:, :first_masked_idx]
    unmasked_positions = new_positions[:first_masked_idx]

    enc_out = encoder_forward(params["encoder"], unmasked,
                              unmasked_positions, enc_heads)
    dec_out = decoder_forward(params["decoder"], enc_out,
                              new_positions, dec_heads)

    masked_input = scrambled[:, first_masked_idx:]
    masked_decoded = dec_out[:, first_masked_idx:]

    stitched = jnp.concatenate([unmasked, masked_decoded], axis=1)
    stitched_viz = jnp.concatenate([unmasked, jnp.zeros_like(masked_decoded)],
                                   axis=1)
    unscrambled_stitched = stitched[:, inv_permutation, :]
    unscrambled_viz = stitched_viz[:, inv_permutation, :]
    return masked_input, masked_decoded, unscrambled_viz, unscrambled_stitched


# ----------------------------------------------------------------------------
# Deterministic parameter initialization (matmul weights stored bf16,
# per-layer params stacked along a leading layer axis)
# ----------------------------------------------------------------------------

def _init_blocks(key, emb_dim, num_blocks):
    hidden = 4 * emb_dim
    s = 0.02

    def one(k):
        kk = jax.random.split(k, 6)
        wq = s * jax.random.normal(kk[0], (emb_dim, emb_dim), jnp.float32)
        wk = s * jax.random.normal(kk[1], (emb_dim, emb_dim), jnp.float32)
        wv = s * jax.random.normal(kk[2], (emb_dim, emb_dim), jnp.float32)
        return {
            "ln1_g": jnp.ones((1, emb_dim), jnp.float32),
            "ln1_b": jnp.zeros((1, emb_dim), jnp.float32),
            "wqkv": jnp.concatenate([wq, wk, wv], axis=1).astype(jnp.bfloat16),
            "bqkv": jnp.zeros((1, 3 * emb_dim), jnp.float32),
            "wo": (s * jax.random.normal(kk[3], (emb_dim, emb_dim),
                                         jnp.float32)).astype(jnp.bfloat16),
            "bo": jnp.zeros((1, emb_dim), jnp.float32),
            "ln2_g": jnp.ones((1, emb_dim), jnp.float32),
            "ln2_b": jnp.zeros((1, emb_dim), jnp.float32),
            "w1": (s * jax.random.normal(kk[4], (emb_dim, hidden),
                                         jnp.float32)).astype(jnp.bfloat16),
            "b1": jnp.zeros((1, hidden), jnp.float32),
            "w2": (s * jax.random.normal(kk[5], (hidden, emb_dim),
                                         jnp.float32)).astype(jnp.bfloat16),
            "b2": jnp.zeros((1, emb_dim), jnp.float32),
        }

    per_layer = [one(k) for k in jax.random.split(key, num_blocks)]
    return jax.tree_util.tree_map(lambda *xs: jnp.stack(xs, axis=0), *per_layer)


def init_params(key, inp_dim, emb_dim, enc_blocks, dec_blocks):
    k_enc, k_dec = jax.random.split(key)
    ke = jax.random.split(k_enc, 3)
    kd = jax.random.split(k_dec, 4)
    s = 0.02
    encoder = {
        "stem_w": (s * jax.random.normal(ke[0], (inp_dim, emb_dim),
                                         jnp.float32)).astype(jnp.bfloat16),
        "stem_b": jnp.zeros((1, emb_dim), jnp.float32),
        "pos_emb": s * jax.random.normal(ke[1], (220, emb_dim), jnp.float32),
        "blocks": _init_blocks(ke[2], emb_dim, enc_blocks),
    }
    decoder = {
        "pos_emb": s * jax.random.normal(kd[0], (220, emb_dim), jnp.float32),
        "mask_emb": s * jax.random.normal(kd[1], (1, emb_dim), jnp.float32),
        "out_w": (s * jax.random.normal(kd[2], (emb_dim, inp_dim),
                                        jnp.float32)).astype(jnp.bfloat16),
        "out_b": jnp.zeros((1, inp_dim), jnp.float32),
        "blocks": _init_blocks(kd[3], emb_dim, dec_blocks),
    }
    return {"encoder": encoder, "decoder": decoder}


# ----------------------------------------------------------------------------
# Main
# ----------------------------------------------------------------------------

if __name__ == "__main__":
    inpDim = 16      # channels per patch
    embDim = 32
    encoderNumHeads, encoderNumBlocks = 4, 2
    decoderNumHeads, decoderNumBlocks = 4, 1
    B, P = 2, 16     # batch, number of patches (<= 220)
    maskingRatio = 0.75

    root = jax.random.PRNGKey(0)
    k_param, k_data, k_perm = jax.random.split(root, 3)

    params = init_params(k_param, inpDim, embDim,
                         encoderNumBlocks, decoderNumBlocks)
    inp_batch = jax.random.normal(k_data, (B, P, inpDim), jnp.float32)

    outs = masked_autoencoder_forward(
        params, inp_batch, k_perm,
        enc_heads=encoderNumHeads, dec_heads=decoderNumHeads,
        masking_ratio=maskingRatio)
    outs = jax.block_until_ready(outs)

    masked_input, masked_decoded, unscrambled_viz, unscrambled_stitched = outs
    first_masked_idx = int(P * (1 - maskingRatio))
    assert masked_input.shape == (B, P - first_masked_idx, inpDim)
    assert masked_decoded.shape == (B, P - first_masked_idx, inpDim)
    assert unscrambled_viz.shape == (B, P, inpDim)
    assert unscrambled_stitched.shape == (B, P, inpDim)
    assert all(bool(jnp.all(jnp.isfinite(o))) for o in outs)
    print("KERNEL_OK")
</pallas_src>

<mosaic_0001>
module attributes {stable_mosaic.version = 11 : i64} {
  func.func @_decoder_kernel(%arg0: i32, %arg1: i32, %arg2: memref<1x4x32xf32, #tpu.memory_space<vmem>>, %arg3: memref<1x32xf32, #tpu.memory_space<vmem>>, %arg4: memref<16x32xf32, #tpu.memory_space<vmem>>, %arg5: memref<1x1x32xf32, #tpu.memory_space<vmem>>, %arg6: memref<1x1x32xf32, #tpu.memory_space<vmem>>, %arg7: memref<1x32x96xbf16, #tpu.memory_space<vmem>>, %arg8: memref<1x1x96xf32, #tpu.memory_space<vmem>>, %arg9: memref<1x32x32xbf16, #tpu.memory_space<vmem>>, %arg10: memref<1x1x32xf32, #tpu.memory_space<vmem>>, %arg11: memref<1x1x32xf32, #tpu.memory_space<vmem>>, %arg12: memref<1x1x32xf32, #tpu.memory_space<vmem>>, %arg13: memref<1x32x128xbf16, #tpu.memory_space<vmem>>, %arg14: memref<1x1x128xf32, #tpu.memory_space<vmem>>, %arg15: memref<1x128x32xbf16, #tpu.memory_space<vmem>>, %arg16: memref<1x1x32xf32, #tpu.memory_space<vmem>>, %arg17: memref<32x16xbf16, #tpu.memory_space<vmem>>, %arg18: memref<1x16xf32, #tpu.memory_space<vmem>>, %arg19: memref<1x16x16xf32, #tpu.memory_space<vmem>>, %arg20: memref<16x32xf32, #tpu.memory_space<vmem>>) attributes {dimension_semantics = [#tpu.dimension_semantics<parallel>, #tpu.dimension_semantics<arbitrary>], iteration_bounds = array<i64: 2, 1>, scalar_prefetch = 0 : i64, scratch_operands = 1 : i64, tpu.core_type = #tpu.core_type<tc>, window_params = [{transform_indices = @transform_0, window_bounds = array<i64: 1, 4, 32>}, {pipeline_mode = #tpu.pipeline_mode<synchronous>, transform_indices = @transform_1, window_bounds = array<i64: 1, 32>}, {pipeline_mode = #tpu.pipeline_mode<synchronous>, transform_indices = @transform_2, window_bounds = array<i64: 16, 32>}, {transform_indices = @transform_3, window_bounds = array<i64: 1, 1, 32>}, {transform_indices = @transform_4, window_bounds = array<i64: 1, 1, 32>}, {transform_indices = @transform_5, window_bounds = array<i64: 1, 32, 96>}, {transform_indices = @transform_6, window_bounds = array<i64: 1, 1, 96>}, {transform_indices = @transform_7, window_bounds = array<i64: 1, 32, 32>}, {transform_indices = @transform_8, window_bounds = array<i64: 1, 1, 32>}, {transform_indices = @transform_9, window_bounds = array<i64: 1, 1, 32>}, {transform_indices = @transform_10, window_bounds = array<i64: 1, 1, 32>}, {transform_indices = @transform_11, window_bounds = array<i64: 1, 32, 128>}, {transform_indices = @transform_12, window_bounds = array<i64: 1, 1, 128>}, {transform_indices = @transform_13, window_bounds = array<i64: 1, 128, 32>}, {transform_indices = @transform_14, window_bounds = array<i64: 1, 1, 32>}, {pipeline_mode = #tpu.pipeline_mode<synchronous>, transform_indices = @transform_15, window_bounds = array<i64: 32, 16>}, {pipeline_mode = #tpu.pipeline_mode<synchronous>, transform_indices = @transform_16, window_bounds = array<i64: 1, 16>}, {transform_indices = @transform_17, window_bounds = array<i64: 1, 16, 16>}]} {
    %c0_i32 = arith.constant 0 : i32
    %0 = arith.cmpi eq, %arg1, %c0_i32 : i32
    %1 = arith.extui %0 : i1 to i32
    %c0_i32_0 = arith.constant 0 : i32
    %2 = arith.cmpi ne, %1, %c0_i32_0 : i32
    scf.if %2 {
      %c0_79 = arith.constant 0 : index
      %c0_80 = arith.constant 0 : index
      %c0_81 = arith.constant 0 : index
      %199 = vector.load %arg2[%c0_79, %c0_80, %c0_81] : memref<1x4x32xf32, #tpu.memory_space<vmem>>, vector<1x4x32xf32>
      %200 = vector.shape_cast %199 : vector<1x4x32xf32> to vector<4x32xf32>
      %c0_82 = arith.constant 0 : index
      %c0_83 = arith.constant 0 : index
      %201 = vector.load %arg3[%c0_82, %c0_83] : memref<1x32xf32, #tpu.memory_space<vmem>>, vector<1x32xf32>
      %202 = vector.shape_cast %201 : vector<1x32xf32> to vector<1x32xf32>
      %203 = vector.broadcast %202 : vector<1x32xf32> to vector<12x32xf32>
      %204 = tpu.concatenate %200, %203 in 0 : vector<4x32xf32>, vector<12x32xf32> -> vector<16x32xf32>
      %c0_84 = arith.constant 0 : index
      %c0_85 = arith.constant 0 : index
      %205 = vector.load %arg4[%c0_84, %c0_85] : memref<16x32xf32, #tpu.memory_space<vmem>>, vector<16x32xf32>
      %206 = arith.addf %204, %205 : vector<16x32xf32>
      %c0_86 = arith.constant 0 : index
      %c0_87 = arith.constant 0 : index
      %207 = vector.load %arg20[%c0_86, %c0_87] : memref<16x32xf32, #tpu.memory_space<vmem>>, vector<16x32xf32>
      tpu.vector_store %arg20[%c0_86, %c0_87], %206 {strides = array<i32>} : memref<16x32xf32, #tpu.memory_space<vmem>>, vector<16x32xf32>,
    } else {
    }
    %c0 = arith.constant 0 : index
    %c0_1 = arith.constant 0 : index
    %3 = vector.load %arg20[%c0, %c0_1] : memref<16x32xf32, #tpu.memory_space<vmem>>, vector<16x32xf32>
    %c0_2 = arith.constant 0 : index
    %c0_3 = arith.constant 0 : index
    %c0_4 = arith.constant 0 : index
    %4 = vector.load %arg5[%c0_2, %c0_3, %c0_4] : memref<1x1x32xf32, #tpu.memory_space<vmem>>, vector<1x1x32xf32>
    %5 = vector.shape_cast %4 : vector<1x1x32xf32> to vector<1x32xf32>
    %c0_5 = arith.constant 0 : index
    %c0_6 = arith.constant 0 : index
    %c0_7 = arith.constant 0 : index
    %6 = vector.load %arg6[%c0_5, %c0_6, %c0_7] : memref<1x1x32xf32, #tpu.memory_space<vmem>>, vector<1x1x32xf32>
    %7 = vector.shape_cast %6 : vector<1x1x32xf32> to vector<1x32xf32>
    %cst = arith.constant dense<0.000000e+00> : vector<16xf32>
    %8 = vector.multi_reduction <add>, %3, %cst [1] : vector<16x32xf32> to vector<16xf32>
    %9 = vector.shape_cast %8 : vector<16xf32> to vector<16x1xf32>
    %cst_8 = arith.constant 3.200000e+01 : f32
    %10 = vector.broadcast %cst_8 : f32 to vector<16x1xf32>
    %11 = arith.divf %9, %10 : vector<16x1xf32>
    %12 = vector.broadcast %11 : vector<16x1xf32> to vector<16x32xf32>
    %13 = arith.subf %3, %12 : vector<16x32xf32>
    %14 = arith.mulf %13, %13 : vector<16x32xf32>
    %cst_9 = arith.constant dense<0.000000e+00> : vector<16xf32>
    %15 = vector.multi_reduction <add>, %14, %cst_9 [1] : vector<16x32xf32> to vector<16xf32>
    %16 = vector.shape_cast %15 : vector<16xf32> to vector<16x1xf32>
    %cst_10 = arith.constant 3.200000e+01 : f32
    %17 = vector.broadcast %cst_10 : f32 to vector<16x1xf32>
    %18 = arith.divf %16, %17 : vector<16x1xf32>
    %19 = vector.broadcast %11 : vector<16x1xf32> to vector<16x32xf32>
    %20 = arith.subf %3, %19 : vector<16x32xf32>
    %cst_11 = arith.constant 9.99999974E-6 : f32
    %21 = vector.broadcast %cst_11 : f32 to vector<16x1xf32>
    %22 = arith.addf %18, %21 : vector<16x1xf32>
    %23 = math.rsqrt %22 : vector<16x1xf32>
    %24 = vector.broadcast %23 : vector<16x1xf32> to vector<16x32xf32>
    %25 = arith.mulf %20, %24 : vector<16x32xf32>
    %26 = vector.broadcast %5 : vector<1x32xf32> to vector<16x32xf32>
    %27 = arith.mulf %25, %26 : vector<16x32xf32>
    %28 = vector.broadcast %7 : vector<1x32xf32> to vector<16x32xf32>
    %29 = arith.addf %27, %28 : vector<16x32xf32>
    %c0_12 = arith.constant 0 : index
    %c0_13 = arith.constant 0 : index
    %c0_14 = arith.constant 0 : index
    %30 = vector.load %arg7[%c0_12, %c0_13, %c0_14] : memref<1x32x96xbf16, #tpu.memory_space<vmem>>, vector<1x32x96xbf16>
    %31 = vector.shape_cast %30 : vector<1x32x96xbf16> to vector<32x96xbf16>
    %32 = arith.truncf %29 : vector<16x32xf32> to vector<16x32xbf16>
    %cst_15 = arith.constant dense<0.000000e+00> : vector<16x96xf32>
    %33 = tpu.matmul %32, %31, %cst_15 {dimension_numbers = #tpu.dot_dimension_numbers<[1], [0], [0], [1], [0, 0, 1, 1], [], []>} : vector<16x32xbf16>, vector<32x96xbf16>, vector<16x96xf32> -> vector<16x96xf32>
    %c0_16 = arith.constant 0 : index
    %c0_17 = arith.constant 0 : index
    %c0_18 = arith.constant 0 : index
    %34 = vector.load %arg8[%c0_16, %c0_17, %c0_18] : memref<1x1x96xf32, #tpu.memory_space<vmem>>, vector<1x1x96xf32>
    %35 = vector.shape_cast %34 : vector<1x1x96xf32> to vector<1x96xf32>
    %36 = vector.broadcast %35 : vector<1x96xf32> to vector<16x96xf32>
    %37 = arith.addf %33, %36 : vector<16x96xf32>
    %38 = vector.extract_strided_slice %37 {offsets = [0, 0], sizes = [16, 32], strides = [1, 1]} : vector<16x96xf32> to vector<16x32xf32>
    %39 = vector.extract_strided_slice %37 {offsets = [0, 32], sizes = [16, 32], strides = [1, 1]} : vector<16x96xf32> to vector<16x32xf32>
    %40 = vector.extract_strided_slice %37 {offsets = [0, 64], sizes = [16, 32], strides = [1, 1]} : vector<16x96xf32> to vector<16x32xf32>
    %41 = vector.extract_strided_slice %38 {offsets = [0, 0], sizes = [16, 8], strides = [1, 1]} : vector<16x32xf32> to vector<16x8xf32>
    %cst_19 = arith.constant 0.353553385 : f32
    %42 = vector.broadcast %cst_19 : f32 to vector<16x8xf32>
    %43 = arith.mulf %41, %42 : vector<16x8xf32>
    %44 = vector.extract_strided_slice %39 {offsets = [0, 0], sizes = [16, 8], strides = [1, 1]} : vector<16x32xf32> to vector<16x8xf32>
    %45 = vector.extract_strided_slice %40 {offsets = [0, 0], sizes = [16, 8], strides = [1, 1]} : vector<16x32xf32> to vector<16x8xf32>
    %46 = arith.truncf %43 : vector<16x8xf32> to vector<16x8xbf16>
    %47 = arith.truncf %44 : vector<16x8xf32> to vector<16x8xbf16>
    %48 = tpu.transpose %47, [1, 0] : vector<16x8xbf16> -> vector<8x16xbf16>
    %cst_20 = arith.constant dense<0.000000e+00> : vector<16x16xf32>
    %49 = tpu.matmul %46, %48, %cst_20 {dimension_numbers = #tpu.dot_dimension_numbers<[1], [0], [0], [1], [0, 0, 1, 1], [], []>} : vector<16x8xbf16>, vector<8x16xbf16>, vector<16x16xf32> -> vector<16x16xf32>
    %cst_21 = arith.constant dense<0xFF800000> : vector<16xf32>
    %50 = vector.multi_reduction <maximumf>, %49, %cst_21 [1] : vector<16x16xf32> to vector<16xf32>
    %51 = vector.shape_cast %50 : vector<16xf32> to vector<16x1xf32>
    %52 = vector.broadcast %51 : vector<16x1xf32> to vector<16x16xf32>
    %53 = arith.subf %49, %52 : vector<16x16xf32>
    %54 = math.exp %53 : vector<16x16xf32>
    %cst_22 = arith.constant dense<0.000000e+00> : vector<16xf32>
    %55 = vector.multi_reduction <add>, %54, %cst_22 [1] : vector<16x16xf32> to vector<16xf32>
    %56 = vector.shape_cast %55 : vector<16xf32> to vector<16x1xf32>
    %57 = arith.truncf %54 : vector<16x16xf32> to vector<16x16xbf16>
    %58 = arith.truncf %45 : vector<16x8xf32> to vector<16x8xbf16>
    %cst_23 = arith.constant dense<0.000000e+00> : vector<16x8xf32>
    %59 = tpu.matmul %57, %58, %cst_23 {dimension_numbers = #tpu.dot_dimension_numbers<[1], [0], [0], [1], [0, 0, 1, 1], [], []>} : vector<16x16xbf16>, vector<16x8xbf16>, vector<16x8xf32> -> vector<16x8xf32>
    %60 = tpu.reciprocal %56 {approx = true} : vector<16x1xf32> -> vector<16x1xf32>
    %61 = vector.broadcast %60 : vector<16x1xf32> to vector<16x8xf32>
    %62 = arith.mulf %59, %61 : vector<16x8xf32>
    %63 = vector.extract_strided_slice %38 {offsets = [0, 8], sizes = [16, 8], strides = [1, 1]} : vector<16x32xf32> to vector<16x8xf32>
    %cst_24 = arith.constant 0.353553385 : f32
    %64 = vector.broadcast %cst_24 : f32 to vector<16x8xf32>
    %65 = arith.mulf %63, %64 : vector<16x8xf32>
    %66 = vector.extract_strided_slice %39 {offsets = [0, 8], sizes = [16, 8], strides = [1, 1]} : vector<16x32xf32> to vector<16x8xf32>
    %67 = vector.extract_strided_slice %40 {offsets = [0, 8], sizes = [16, 8], strides = [1, 1]} : vector<16x32xf32> to vector<16x8xf32>
    %68 = arith.truncf %65 : vector<16x8xf32> to vector<16x8xbf16>
    %69 = arith.truncf %66 : vector<16x8xf32> to vector<16x8xbf16>
    %70 = tpu.transpose %69, [1, 0] : vector<16x8xbf16> -> vector<8x16xbf16>
    %cst_25 = arith.constant dense<0.000000e+00> : vector<16x16xf32>
    %71 = tpu.matmul %68, %70, %cst_25 {dimension_numbers = #tpu.dot_dimension_numbers<[1], [0], [0], [1], [0, 0, 1, 1], [], []>} : vector<16x8xbf16>, vector<8x16xbf16>, vector<16x16xf32> -> vector<16x16xf32>
    %cst_26 = arith.constant dense<0xFF800000> : vector<16xf32>
    %72 = vector.multi_reduction <maximumf>, %71, %cst_26 [1] : vector<16x16xf32> to vector<16xf32>
    %73 = vector.shape_cast %72 : vector<16xf32> to vector<16x1xf32>
    %74 = vector.broadcast %73 : vector<16x1xf32> to vector<16x16xf32>
    %75 = arith.subf %71, %74 : vector<16x16xf32>
    %76 = math.exp %75 : vector<16x16xf32>
    %cst_27 = arith.constant dense<0.000000e+00> : vector<16xf32>
    %77 = vector.multi_reduction <add>, %76, %cst_27 [1] : vector<16x16xf32> to vector<16xf32>
    %78 = vector.shape_cast %77 : vector<16xf32> to vector<16x1xf32>
    %79 = arith.truncf %76 : vector<16x16xf32> to vector<16x16xbf16>
    %80 = arith.truncf %67 : vector<16x8xf32> to vector<16x8xbf16>
    %cst_28 = arith.constant dense<0.000000e+00> : vector<16x8xf32>
    %81 = tpu.matmul %79, %80, %cst_28 {dimension_numbers = #tpu.dot_dimension_numbers<[1], [0], [0], [1], [0, 0, 1, 1], [], []>} : vector<16x16xbf16>, vector<16x8xbf16>, vector<16x8xf32> -> vector<16x8xf32>
    %82 = tpu.reciprocal %78 {approx = true} : vector<16x1xf32> -> vector<16x1xf32>
    %83 = vector.broadcast %82 : vector<16x1xf32> to vector<16x8xf32>
    %84 = arith.mulf %81, %83 : vector<16x8xf32>
    %85 = vector.extract_strided_slice %38 {offsets = [0, 16], sizes = [16, 8], strides = [1, 1]} : vector<16x32xf32> to vector<16x8xf32>
    %cst_29 = arith.constant 0.353553385 : f32
    %86 = vector.broadcast %cst_29 : f32 to vector<16x8xf32>
    %87 = arith.mulf %85, %86 : vector<16x8xf32>
    %88 = vector.extract_strided_slice %39 {offsets = [0, 16], sizes = [16, 8], strides = [1, 1]} : vector<16x32xf32> to vector<16x8xf32>
    %89 = vector.extract_strided_slice %40 {offsets = [0, 16], sizes = [16, 8], strides = [1, 1]} : vector<16x32xf32> to vector<16x8xf32>
    %90 = arith.truncf %87 : vector<16x8xf32> to vector<16x8xbf16>
    %91 = arith.truncf %88 : vector<16x8xf32> to vector<16x8xbf16>
    %92 = tpu.transpose %91, [1, 0] : vector<16x8xbf16> -> vector<8x16xbf16>
    %cst_30 = arith.constant dense<0.000000e+00> : vector<16x16xf32>
    %93 = tpu.matmul %90, %92, %cst_30 {dimension_numbers = #tpu.dot_dimension_numbers<[1], [0], [0], [1], [0, 0, 1, 1], [], []>} : vector<16x8xbf16>, vector<8x16xbf16>, vector<16x16xf32> -> vector<16x16xf32>
    %cst_31 = arith.constant dense<0xFF800000> : vector<16xf32>
    %94 = vector.multi_reduction <maximumf>, %93, %cst_31 [1] : vector<16x16xf32> to vector<16xf32>
    %95 = vector.shape_cast %94 : vector<16xf32> to vector<16x1xf32>
    %96 = vector.broadcast %95 : vector<16x1xf32> to vector<16x16xf32>
    %97 = arith.subf %93, %96 : vector<16x16xf32>
    %98 = math.exp %97 : vector<16x16xf32>
    %cst_32 = arith.constant dense<0.000000e+00> : vector<16xf32>
    %99 = vector.multi_reduction <add>, %98, %cst_32 [1] : vector<16x16xf32> to vector<16xf32>
    %100 = vector.shape_cast %99 : vector<16xf32> to vector<16x1xf32>
    %101 = arith.truncf %98 : vector<16x16xf32> to vector<16x16xbf16>
    %102 = arith.truncf %89 : vector<16x8xf32> to vector<16x8xbf16>
    %cst_33 = arith.constant dense<0.000000e+00> : vector<16x8xf32>
    %103 = tpu.matmul %101, %102, %cst_33 {dimension_numbers = #tpu.dot_dimension_numbers<[1], [0], [0], [1], [0, 0, 1, 1], [], []>} : vector<16x16xbf16>, vector<16x8xbf16>, vector<16x8xf32> -> vector<16x8xf32>
    %104 = tpu.reciprocal %100 {approx = true} : vector<16x1xf32> -> vector<16x1xf32>
    %105 = vector.broadcast %104 : vector<16x1xf32> to vector<16x8xf32>
    %106 = arith.mulf %103, %105 : vector<16x8xf32>
    %107 = vector.extract_strided_slice %38 {offsets = [0, 24], sizes = [16, 8], strides = [1, 1]} : vector<16x32xf32> to vector<16x8xf32>
    %cst_34 = arith.constant 0.353553385 : f32
    %108 = vector.broadcast %cst_34 : f32 to vector<16x8xf32>
    %109 = arith.mulf %107, %108 : vector<16x8xf32>
    %110 = vector.extract_strided_slice %39 {offsets = [0, 24], sizes = [16, 8], strides = [1, 1]} : vector<16x32xf32> to vector<16x8xf32>
    %111 = vector.extract_strided_slice %40 {offsets = [0, 24], sizes = [16, 8], strides = [1, 1]} : vector<16x32xf32> to vector<16x8xf32>
    %112 = arith.truncf %109 : vector<16x8xf32> to vector<16x8xbf16>
    %113 = arith.truncf %110 : vector<16x8xf32> to vector<16x8xbf16>
    %114 = tpu.transpose %113, [1, 0] : vector<16x8xbf16> -> vector<8x16xbf16>
    %cst_35 = arith.constant dense<0.000000e+00> : vector<16x16xf32>
    %115 = tpu.matmul %112, %114, %cst_35 {dimension_numbers = #tpu.dot_dimension_numbers<[1], [0], [0], [1], [0, 0, 1, 1], [], []>} : vector<16x8xbf16>, vector<8x16xbf16>, vector<16x16xf32> -> vector<16x16xf32>
    %cst_36 = arith.constant dense<0xFF800000> : vector<16xf32>
    %116 = vector.multi_reduction <maximumf>, %115, %cst_36 [1] : vector<16x16xf32> to vector<16xf32>
    %117 = vector.shape_cast %116 : vector<16xf32> to vector<16x1xf32>
    %118 = vector.broadcast %117 : vector<16x1xf32> to vector<16x16xf32>
    %119 = arith.subf %115, %118 : vector<16x16xf32>
    %120 = math.exp %119 : vector<16x16xf32>
    %cst_37 = arith.constant dense<0.000000e+00> : vector<16xf32>
    %121 = vector.multi_reduction <add>, %120, %cst_37 [1] : vector<16x16xf32> to vector<16xf32>
    %122 = vector.shape_cast %121 : vector<16xf32> to vector<16x1xf32>
    %123 = arith.truncf %120 : vector<16x16xf32> to vector<16x16xbf16>
    %124 = arith.truncf %111 : vector<16x8xf32> to vector<16x8xbf16>
    %cst_38 = arith.constant dense<0.000000e+00> : vector<16x8xf32>
    %125 = tpu.matmul %123, %124, %cst_38 {dimension_numbers = #tpu.dot_dimension_numbers<[1], [0], [0], [1], [0, 0, 1, 1], [], []>} : vector<16x16xbf16>, vector<16x8xbf16>, vector<16x8xf32> -> vector<16x8xf32>
    %126 = tpu.reciprocal %122 {approx = true} : vector<16x1xf32> -> vector<16x1xf32>
    %127 = vector.broadcast %126 : vector<16x1xf32> to vector<16x8xf32>
    %128 = arith.mulf %125, %127 : vector<16x8xf32>
    %129 = tpu.concatenate %62, %84, %106, %128 in 1 : vector<16x8xf32>, vector<16x8xf32>, vector<16x8xf32>, vector<16x8xf32> -> vector<16x32xf32>
    %c0_39 = arith.constant 0 : index
    %c0_40 = arith.constant 0 : index
    %c0_41 = arith.constant 0 : index
    %130 = vector.load %arg9[%c0_39, %c0_40, %c0_41] : memref<1x32x32xbf16, #tpu.memory_space<vmem>>, vector<1x32x32xbf16>
    %131 = vector.shape_cast %130 : vector<1x32x32xbf16> to vector<32x32xbf16>
    %132 = arith.truncf %129 : vector<16x32xf32> to vector<16x32xbf16>
    %cst_42 = arith.constant dense<0.000000e+00> : vector<16x32xf32>
    %133 = tpu.matmul %132, %131, %cst_42 {dimension_numbers = #tpu.dot_dimension_numbers<[1], [0], [0], [1], [0, 0, 1, 1], [], []>} : vector<16x32xbf16>, vector<32x32xbf16>, vector<16x32xf32> -> vector<16x32xf32>
    %c0_43 = arith.constant 0 : index
    %c0_44 = arith.constant 0 : index
    %c0_45 = arith.constant 0 : index
    %134 = vector.load %arg10[%c0_43, %c0_44, %c0_45] : memref<1x1x32xf32, #tpu.memory_space<vmem>>, vector<1x1x32xf32>
    %135 = vector.shape_cast %134 : vector<1x1x32xf32> to vector<1x32xf32>
    %136 = vector.broadcast %135 : vector<1x32xf32> to vector<16x32xf32>
    %137 = arith.addf %133, %136 : vector<16x32xf32>
    %138 = arith.addf %3, %137 : vector<16x32xf32>
    %c0_46 = arith.constant 0 : index
    %c0_47 = arith.constant 0 : index
    %c0_48 = arith.constant 0 : index
    %139 = vector.load %arg11[%c0_46, %c0_47, %c0_48] : memref<1x1x32xf32, #tpu.memory_space<vmem>>, vector<1x1x32xf32>
    %140 = vector.shape_cast %139 : vector<1x1x32xf32> to vector<1x32xf32>
    %c0_49 = arith.constant 0 : index
    %c0_50 = arith.constant 0 : index
    %c0_51 = arith.constant 0 : index
    %141 = vector.load %arg12[%c0_49, %c0_50, %c0_51] : memref<1x1x32xf32, #tpu.memory_space<vmem>>, vector<1x1x32xf32>
    %142 = vector.shape_cast %141 : vector<1x1x32xf32> to vector<1x32xf32>
    %cst_52 = arith.constant dense<0.000000e+00> : vector<16xf32>
    %143 = vector.multi_reduction <add>, %138, %cst_52 [1] : vector<16x32xf32> to vector<16xf32>
    %144 = vector.shape_cast %143 : vector<16xf32> to vector<16x1xf32>
    %cst_53 = arith.constant 3.200000e+01 : f32
    %145 = vector.broadcast %cst_53 : f32 to vector<16x1xf32>
    %146 = arith.divf %144, %145 : vector<16x1xf32>
    %147 = vector.broadcast %146 : vector<16x1xf32> to vector<16x32xf32>
    %148 = arith.subf %138, %147 : vector<16x32xf32>
    %149 = arith.mulf %148, %148 : vector<16x32xf32>
    %cst_54 = arith.constant dense<0.000000e+00> : vector<16xf32>
    %150 = vector.multi_reduction <add>, %149, %cst_54 [1] : vector<16x32xf32> to vector<16xf32>
    %151 = vector.shape_cast %150 : vector<16xf32> to vector<16x1xf32>
    %cst_55 = arith.constant 3.200000e+01 : f32
    %152 = vector.broadcast %cst_55 : f32 to vector<16x1xf32>
    %153 = arith.divf %151, %152 : vector<16x1xf32>
    %154 = vector.broadcast %146 : vector<16x1xf32> to vector<16x32xf32>
    %155 = arith.subf %138, %154 : vector<16x32xf32>
    %cst_56 = arith.constant 9.99999974E-6 : f32
    %156 = vector.broadcast %cst_56 : f32 to vector<16x1xf32>
    %157 = arith.addf %153, %156 : vector<16x1xf32>
    %158 = math.rsqrt %157 : vector<16x1xf32>
    %159 = vector.broadcast %158 : vector<16x1xf32> to vector<16x32xf32>
    %160 = arith.mulf %155, %159 : vector<16x32xf32>
    %161 = vector.broadcast %140 : vector<1x32xf32> to vector<16x32xf32>
    %162 = arith.mulf %160, %161 : vector<16x32xf32>
    %163 = vector.broadcast %142 : vector<1x32xf32> to vector<16x32xf32>
    %164 = arith.addf %162, %163 : vector<16x32xf32>
    %c0_57 = arith.constant 0 : index
    %c0_58 = arith.constant 0 : index
    %c0_59 = arith.constant 0 : index
    %165 = vector.load %arg13[%c0_57, %c0_58, %c0_59] : memref<1x32x128xbf16, #tpu.memory_space<vmem>>, vector<1x32x128xbf16>
    %166 = vector.shape_cast %165 : vector<1x32x128xbf16> to vector<32x128xbf16>
    %167 = arith.truncf %164 : vector<16x32xf32> to vector<16x32xbf16>
    %cst_60 = arith.constant dense<0.000000e+00> : vector<16x128xf32>
    %168 = tpu.matmul %167, %166, %cst_60 {dimension_numbers = #tpu.dot_dimension_numbers<[1], [0], [0], [1], [0, 0, 1, 1], [], []>} : vector<16x32xbf16>, vector<32x128xbf16>, vector<16x128xf32> -> vector<16x128xf32>
    %c0_61 = arith.constant 0 : index
    %c0_62 = arith.constant 0 : index
    %c0_63 = arith.constant 0 : index
    %169 = vector.load %arg14[%c0_61, %c0_62, %c0_63] : memref<1x1x128xf32, #tpu.memory_space<vmem>>, vector<1x1x128xf32>
    %170 = vector.shape_cast %169 : vector<1x1x128xf32> to vector<1x128xf32>
    %171 = vector.broadcast %170 : vector<1x128xf32> to vector<16x128xf32>
    %172 = arith.addf %168, %171 : vector<16x128xf32>
    %173 = arith.mulf %172, %172 : vector<16x128xf32>
    %174 = arith.mulf %172, %173 : vector<16x128xf32>
    %cst_64 = arith.constant 4.471500e-02 : f32
    %175 = vector.broadcast %cst_64 : f32 to vector<16x128xf32>
    %176 = arith.mulf %175, %174 : vector<16x128xf32>
    %177 = arith.addf %172, %176 : vector<16x128xf32>
    %cst_65 = arith.constant 0.797884583 : f32
    %178 = vector.broadcast %cst_65 : f32 to vector<16x128xf32>
    %179 = arith.mulf %178, %177 : vector<16x128xf32>
    %180 = math.tanh %179 : vector<16x128xf32>
    %cst_66 = arith.constant 1.000000e+00 : f32
    %181 = vector.broadcast %cst_66 : f32 to vector<16x128xf32>
    %182 = arith.addf %181, %180 : vector<16x128xf32>
    %cst_67 = arith.constant 5.000000e-01 : f32
    %183 = vector.broadcast %cst_67 : f32 to vector<16x128xf32>
    %184 = arith.mulf %183, %182 : vector<16x128xf32>
    %185 = arith.mulf %172, %184 : vector<16x128xf32>
    %c0_68 = arith.constant 0 : index
    %c0_69 = arith.constant 0 : index
    %c0_70 = arith.constant 0 : index
    %186 = vector.load %arg15[%c0_68, %c0_69, %c0_70] : memref<1x128x32xbf16, #tpu.memory_space<vmem>>, vector<1x128x32xbf16>
    %187 = vector.shape_cast %186 : vector<1x128x32xbf16> to vector<128x32xbf16>
    %188 = arith.truncf %185 : vector<16x128xf32> to vector<16x128xbf16>
    %cst_71 = arith.constant dense<0.000000e+00> : vector<16x32xf32>
    %189 = tpu.matmul %188, %187, %cst_71 {dimension_numbers = #tpu.dot_dimension_numbers<[1], [0], [0], [1], [0, 0, 1, 1], [], []>} : vector<16x128xbf16>, vector<128x32xbf16>, vector<16x32xf32> -> vector<16x32xf32>
    %c0_72 = arith.constant 0 : index
    %c0_73 = arith.constant 0 : index
    %c0_74 = arith.constant 0 : index
    %190 = vector.load %arg16[%c0_72, %c0_73, %c0_74] : memref<1x1x32xf32, #tpu.memory_space<vmem>>, vector<1x1x32xf32>
    %191 = vector.shape_cast %190 : vector<1x1x32xf32> to vector<1x32xf32>
    %192 = vector.broadcast %191 : vector<1x32xf32> to vector<16x32xf32>
    %193 = arith.addf %189, %192 : vector<16x32xf32>
    %194 = arith.addf %138, %193 : vector<16x32xf32>
    %c0_75 = arith.constant 0 : index
    %c0_76 = arith.constant 0 : index
    %195 = vector.load %arg20[%c0_75, %c0_76] : memref<16x32xf32, #tpu.memory_space<vmem>>, vector<16x32xf32>
    tpu.vector_store %arg20[%c0_75, %c0_76], %194 {strides = array<i32>} : memref<16x32xf32, #tpu.memory_space<vmem>>, vector<16x32xf32>,
    %c0_i32_77 = arith.constant 0 : i32
    %196 = arith.cmpi eq, %arg1, %c0_i32_77 : i32
    %197 = arith.extui %196 : i1 to i32
    %c0_i32_78 = arith.constant 0 : i32
    %198 = arith.cmpi ne, %197, %c0_i32_78 : i32
    scf.if %198 {
      %c0_79 = arith.constant 0 : index
      %c0_80 = arith.constant 0 : index
      %199 = vector.load %arg20[%c0_79, %c0_80] : memref<16x32xf32, #tpu.memory_space<vmem>>, vector<16x32xf32>
      %c0_81 = arith.constant 0 : index
      %c0_82 = arith.constant 0 : index
      %200 = vector.load %arg17[%c0_81, %c0_82] : memref<32x16xbf16, #tpu.memory_space<vmem>>, vector<32x16xbf16>
      %201 = arith.truncf %199 : vector<16x32xf32> to vector<16x32xbf16>
      %cst_83 = arith.constant dense<0.000000e+00> : vector<16x16xf32>
      %202 = tpu.matmul %201, %200, %cst_83 {dimension_numbers = #tpu.dot_dimension_numbers<[1], [0], [0], [1], [0, 0, 1, 1], [], []>} : vector<16x32xbf16>, vector<32x16xbf16>, vector<16x16xf32> -> vector<16x16xf32>
      %c0_84 = arith.constant 0 : index
      %c0_85 = arith.constant 0 : index
      %203 = vector.load %arg18[%c0_84, %c0_85] : memref<1x16xf32, #tpu.memory_space<vmem>>, vector<1x16xf32>
      %204 = vector.broadcast %203 : vector<1x16xf32> to vector<16x16xf32>
      %205 = arith.addf %202, %204 : vector<16x16xf32>
      %c0_86 = arith.constant 0 : index
      %c0_87 = arith.constant 0 : index
      %c0_88 = arith.constant 0 : index
      %206 = vector.load %arg19[%c0_86, %c0_87, %c0_88] : memref<1x16x16xf32, #tpu.memory_space<vmem>>, vector<1x16x16xf32>
      %207 = vector.shape_cast %206 : vector<1x16x16xf32> to vector<16x16xf32>
      %208 = vector.shape_cast %205 : vector<16x16xf32> to vector<1x16x16xf32>
      tpu.vector_store %arg19[%c0_86, %c0_87, %c0_88], %208 {strides = array<i32>} : memref<1x16x16xf32, #tpu.memory_space<vmem>>, vector<1x16x16xf32>,
    } else {
    }
    return
  }
  func.func @transform_0(%arg0: i32, %arg1: i32) -> (i32, i32, i32) {
    %c0_i32 = arith.constant 0 : i32
    %c0_i32_0 = arith.constant 0 : i32
    %c0_i32_1 = arith.constant 0 : i32
    return %arg0, %c0_i32, %c0_i32_0 : i32, i32, i32
  }
  func.func @transform_1(%arg0: i32, %arg1: i32) -> (i32, i32) {
    %c0_i32 = arith.constant 0 : i32
    %c0_i32_0 = arith.constant 0 : i32
    %c0_i32_1 = arith.constant 0 : i32
    return %c0_i32, %c0_i32_0 : i32, i32
  }
  func.func @transform_2(%arg0: i32, %arg1: i32) -> (i32, i32) {
    %c0_i32 = arith.constant 0 : i32
    %c0_i32_0 = arith.constant 0 : i32
    %c0_i32_1 = arith.constant 0 : i32
    return %c0_i32, %c0_i32_0 : i32, i32
  }
  func.func @transform_3(%arg0: i32, %arg1: i32) -> (i32, i32, i32) {
    %c0_i32 = arith.constant 0 : i32
    %c0_i32_0 = arith.constant 0 : i32
    %c0_i32_1 = arith.constant 0 : i32
    return %arg1, %c0_i32, %c0_i32_0 : i32, i32, i32
  }
  func.func @transform_4(%arg0: i32, %arg1: i32) -> (i32, i32, i32) {
    %c0_i32 = arith.constant 0 : i32
    %c0_i32_0 = arith.constant 0 : i32
    %c0_i32_1 = arith.constant 0 : i32
    return %arg1, %c0_i32, %c0_i32_0 : i32, i32, i32
  }
  func.func @transform_5(%arg0: i32, %arg1: i32) -> (i32, i32, i32) {
    %c0_i32 = arith.constant 0 : i32
    %c0_i32_0 = arith.constant 0 : i32
    %c0_i32_1 = arith.constant 0 : i32
    return %arg1, %c0_i32, %c0_i32_0 : i32, i32, i32
  }
  func.func @transform_6(%arg0: i32, %arg1: i32) -> (i32, i32, i32) {
    %c0_i32 = arith.constant 0 : i32
    %c0_i32_0 = arith.constant 0 : i32
    %c0_i32_1 = arith.constant 0 : i32
    return %arg1, %c0_i32, %c0_i32_0 : i32, i32, i32
  }
  func.func @transform_7(%arg0: i32, %arg1: i32) -> (i32, i32, i32) {
    %c0_i32 = arith.constant 0 : i32
    %c0_i32_0 = arith.constant 0 : i32
    %c0_i32_1 = arith.constant 0 : i32
    return %arg1, %c0_i32, %c0_i32_0 : i32, i32, i32
  }
  func.func @transform_8(%arg0: i32, %arg1: i32) -> (i32, i32, i32) {
    %c0_i32 = arith.constant 0 : i32
    %c0_i32_0 = arith.constant 0 : i32
    %c0_i32_1 = arith.constant 0 : i32
    return %arg1, %c0_i32, %c0_i32_0 : i32, i32, i32
  }
  func.func @transform_9(%arg0: i32, %arg1: i32) -> (i32, i32, i32) {
    %c0_i32 = arith.constant 0 : i32
    %c0_i32_0 = arith.constant 0 : i32
    %c0_i32_1 = arith.constant 0 : i32
    return %arg1, %c0_i32, %c0_i32_0 : i32, i32, i32
  }
  func.func @transform_10(%arg0: i32, %arg1: i32) -> (i32, i32, i32) {
    %c0_i32 = arith.constant 0 : i32
    %c0_i32_0 = arith.constant 0 : i32
    %c0_i32_1 = arith.constant 0 : i32
    return %arg1, %c0_i32, %c0_i32_0 : i32, i32, i32
  }
  func.func @transform_11(%arg0: i32, %arg1: i32) -> (i32, i32, i32) {
    %c0_i32 = arith.constant 0 : i32
    %c0_i32_0 = arith.constant 0 : i32
    %c0_i32_1 = arith.constant 0 : i32
    return %arg1, %c0_i32, %c0_i32_0 : i32, i32, i32
  }
  func.func @transform_12(%arg0: i32, %arg1: i32) -> (i32, i32, i32) {
    %c0_i32 = arith.constant 0 : i32
    %c0_i32_0 = arith.constant 0 : i32
    %c0_i32_1 = arith.constant 0 : i32
    return %arg1, %c0_i32, %c0_i32_0 : i32, i32, i32
  }
  func.func @transform_13(%arg0: i32, %arg1: i32) -> (i32, i32, i32) {
    %c0_i32 = arith.constant 0 : i32
    %c0_i32_0 = arith.constant 0 : i32
    %c0_i32_1 = arith.constant 0 : i32
    return %arg1, %c0_i32, %c0_i32_0 : i32, i32, i32
  }
  func.func @transform_14(%arg0: i32, %arg1: i32) -> (i32, i32, i32) {
    %c0_i32 = arith.constant 0 : i32
    %c0_i32_0 = arith.constant 0 : i32
    %c0_i32_1 = arith.constant 0 : i32
    return %arg1, %c0_i32, %c0_i32_0 : i32, i32, i32
  }
  func.func @transform_15(%arg0: i32, %arg1: i32) -> (i32, i32) {
    %c0_i32 = arith.constant 0 : i32
    %c0_i32_0 = arith.constant 0 : i32
    %c0_i32_1 = arith.constant 0 : i32
    return %c0_i32, %c0_i32_0 : i32, i32
  }
  func.func @transform_16(%arg0: i32, %arg1: i32) -> (i32, i32) {
    %c0_i32 = arith.constant 0 : i32
    %c0_i32_0 = arith.constant 0 : i32
    %c0_i32_1 = arith.constant 0 : i32
    return %c0_i32, %c0_i32_0 : i32, i32
  }
  func.func @transform_17(%arg0: i32, %arg1: i32) -> (i32, i32, i32) {
    %c0_i32 = arith.constant 0 : i32
    %c0_i32_0 = arith.constant 0 : i32
    %c0_i32_1 = arith.constant 0 : i32
    return %arg0, %c0_i32, %c0_i32_0 : i32, i32, i32
  }
}

module attributes {stable_mosaic.version = 11 : i64} {
  func.func @_encoder_kernel(%arg0: i32, %arg1: i32, %arg2: memref<1x4x16xf32, #tpu.memory_space<vmem>>, %arg3: memref<16x32xbf16, #tpu.memory_space<vmem>>, %arg4: memref<1x32xf32, #tpu.memory_space<vmem>>, %arg5: memref<4x32xf32, #tpu.memory_space<vmem>>, %arg6: memref<1x1x32xf32, #tpu.memory_space<vmem>>, %arg7: memref<1x1x32xf32, #tpu.memory_space<vmem>>, %arg8: memref<1x32x96xbf16, #tpu.memory_space<vmem>>, %arg9: memref<1x1x96xf32, #tpu.memory_space<vmem>>, %arg10: memref<1x32x32xbf16, #tpu.memory_space<vmem>>, %arg11: memref<1x1x32xf32, #tpu.memory_space<vmem>>, %arg12: memref<1x1x32xf32, #tpu.memory_space<vmem>>, %arg13: memref<1x1x32xf32, #tpu.memory_space<vmem>>, %arg14: memref<1x32x128xbf16, #tpu.memory_space<vmem>>, %arg15: memref<1x1x128xf32, #tpu.memory_space<vmem>>, %arg16: memref<1x128x32xbf16, #tpu.memory_space<vmem>>, %arg17: memref<1x1x32xf32, #tpu.memory_space<vmem>>, %arg18: memref<1x4x32xf32, #tpu.memory_space<vmem>>, %arg19: memref<4x32xf32, #tpu.memory_space<vmem>>) attributes {dimension_semantics = [#tpu.dimension_semantics<parallel>, #tpu.dimension_semantics<arbitrary>], iteration_bounds = array<i64: 2, 2>, scalar_prefetch = 0 : i64, scratch_operands = 1 : i64, tpu.core_type = #tpu.core_type<tc>, window_params = [{transform_indices = @transform_0, window_bounds = array<i64: 1, 4, 16>}, {pipeline_mode = #tpu.pipeline_mode<synchronous>, transform_indices = @transform_1, window_bounds = array<i64: 16, 32>}, {pipeline_mode = #tpu.pipeline_mode<synchronous>, transform_indices = @transform_2, window_bounds = array<i64: 1, 32>}, {pipeline_mode = #tpu.pipeline_mode<synchronous>, transform_indices = @transform_3, window_bounds = array<i64: 4, 32>}, {transform_indices = @transform_4, window_bounds = array<i64: 1, 1, 32>}, {transform_indices = @transform_5, window_bounds = array<i64: 1, 1, 32>}, {transform_indices = @transform_6, window_bounds = array<i64: 1, 32, 96>}, {transform_indices = @transform_7, window_bounds = array<i64: 1, 1, 96>}, {transform_indices = @transform_8, window_bounds = array<i64: 1, 32, 32>}, {transform_indices = @transform_9, window_bounds = array<i64: 1, 1, 32>}, {transform_indices = @transform_10, window_bounds = array<i64: 1, 1, 32>}, {transform_indices = @transform_11, window_bounds = array<i64: 1, 1, 32>}, {transform_indices = @transform_12, window_bounds = array<i64: 1, 32, 128>}, {transform_indices = @transform_13, window_bounds = array<i64: 1, 1, 128>}, {transform_indices = @transform_14, window_bounds = array<i64: 1, 128, 32>}, {transform_indices = @transform_15, window_bounds = array<i64: 1, 1, 32>}, {transform_indices = @transform_16, window_bounds = array<i64: 1, 4, 32>}]} {
    %c0_i32 = arith.constant 0 : i32
    %0 = arith.cmpi eq, %arg1, %c0_i32 : i32
    %1 = arith.extui %0 : i1 to i32
    %c0_i32_0 = arith.constant 0 : i32
    %2 = arith.cmpi ne, %1, %c0_i32_0 : i32
    scf.if %2 {
      %c0_78 = arith.constant 0 : index
      %c0_79 = arith.constant 0 : index
      %c0_80 = arith.constant 0 : index
      %199 = vector.load %arg2[%c0_78, %c0_79, %c0_80] : memref<1x4x16xf32, #tpu.memory_space<vmem>>, vector<1x4x16xf32>
      %200 = vector.shape_cast %199 : vector<1x4x16xf32> to vector<4x16xf32>
      %c0_81 = arith.constant 0 : index
      %c0_82 = arith.constant 0 : index
      %201 = vector.load %arg3[%c0_81, %c0_82] : memref<16x32xbf16, #tpu.memory_space<vmem>>, vector<16x32xbf16>
      %202 = arith.truncf %200 : vector<4x16xf32> to vector<4x16xbf16>
      %cst_83 = arith.constant dense<0.000000e+00> : vector<4x32xf32>
      %203 = tpu.matmul %202, %201, %cst_83 {dimension_numbers = #tpu.dot_dimension_numbers<[1], [0], [0], [1], [0, 0, 1, 1], [], []>} : vector<4x16xbf16>, vector<16x32xbf16>, vector<4x32xf32> -> vector<4x32xf32>
      %c0_84 = arith.constant 0 : index
      %c0_85 = arith.constant 0 : index
      %204 = vector.load %arg4[%c0_84, %c0_85] : memref<1x32xf32, #tpu.memory_space<vmem>>, vector<1x32xf32>
      %205 = vector.broadcast %204 : vector<1x32xf32> to vector<4x32xf32>
      %206 = arith.addf %203, %205 : vector<4x32xf32>
      %c0_86 = arith.constant 0 : index
      %c0_87 = arith.constant 0 : index
      %207 = vector.load %arg5[%c0_86, %c0_87] : memref<4x32xf32, #tpu.memory_space<vmem>>, vector<4x32xf32>
      %208 = arith.addf %206, %207 : vector<4x32xf32>
      %c0_88 = arith.constant 0 : index
      %c0_89 = arith.constant 0 : index
      %209 = vector.load %arg19[%c0_88, %c0_89] : memref<4x32xf32, #tpu.memory_space<vmem>>, vector<4x32xf32>
      tpu.vector_store %arg19[%c0_88, %c0_89], %208 {strides = array<i32>} : memref<4x32xf32, #tpu.memory_space<vmem>>, vector<4x32xf32>,
    } else {
    }
    %c0 = arith.constant 0 : index
    %c0_1 = arith.constant 0 : index
    %3 = vector.load %arg19[%c0, %c0_1] : memref<4x32xf32, #tpu.memory_space<vmem>>, vector<4x32xf32>
    %c0_2 = arith.constant 0 : index
    %c0_3 = arith.constant 0 : index
    %c0_4 = arith.constant 0 : index
    %4 = vector.load %arg6[%c0_2, %c0_3, %c0_4] : memref<1x1x32xf32, #tpu.memory_space<vmem>>, vector<1x1x32xf32>
    %5 = vector.shape_cast %4 : vector<1x1x32xf32> to vector<1x32xf32>
    %c0_5 = arith.constant 0 : index
    %c0_6 = arith.constant 0 : index
    %c0_7 = arith.constant 0 : index
    %6 = vector.load %arg7[%c0_5, %c0_6, %c0_7] : memref<1x1x32xf32, #tpu.memory_space<vmem>>, vector<1x1x32xf32>
    %7 = vector.shape_cast %6 : vector<1x1x32xf32> to vector<1x32xf32>
    %cst = arith.constant dense<0.000000e+00> : vector<4xf32>
    %8 = vector.multi_reduction <add>, %3, %cst [1] : vector<4x32xf32> to vector<4xf32>
    %9 = vector.shape_cast %8 : vector<4xf32> to vector<4x1xf32>
    %cst_8 = arith.constant 3.200000e+01 : f32
    %10 = vector.broadcast %cst_8 : f32 to vector<4x1xf32>
    %11 = arith.divf %9, %10 : vector<4x1xf32>
    %12 = vector.broadcast %11 : vector<4x1xf32> to vector<4x32xf32>
    %13 = arith.subf %3, %12 : vector<4x32xf32>
    %14 = arith.mulf %13, %13 : vector<4x32xf32>
    %cst_9 = arith.constant dense<0.000000e+00> : vector<4xf32>
    %15 = vector.multi_reduction <add>, %14, %cst_9 [1] : vector<4x32xf32> to vector<4xf32>
    %16 = vector.shape_cast %15 : vector<4xf32> to vector<4x1xf32>
    %cst_10 = arith.constant 3.200000e+01 : f32
    %17 = vector.broadcast %cst_10 : f32 to vector<4x1xf32>
    %18 = arith.divf %16, %17 : vector<4x1xf32>
    %19 = vector.broadcast %11 : vector<4x1xf32> to vector<4x32xf32>
    %20 = arith.subf %3, %19 : vector<4x32xf32>
    %cst_11 = arith.constant 9.99999974E-6 : f32
    %21 = vector.broadcast %cst_11 : f32 to vector<4x1xf32>
    %22 = arith.addf %18, %21 : vector<4x1xf32>
    %23 = math.rsqrt %22 : vector<4x1xf32>
    %24 = vector.broadcast %23 : vector<4x1xf32> to vector<4x32xf32>
    %25 = arith.mulf %20, %24 : vector<4x32xf32>
    %26 = vector.broadcast %5 : vector<1x32xf32> to vector<4x32xf32>
    %27 = arith.mulf %25, %26 : vector<4x32xf32>
    %28 = vector.broadcast %7 : vector<1x32xf32> to vector<4x32xf32>
    %29 = arith.addf %27, %28 : vector<4x32xf32>
    %c0_12 = arith.constant 0 : index
    %c0_13 = arith.constant 0 : index
    %c0_14 = arith.constant 0 : index
    %30 = vector.load %arg8[%c0_12, %c0_13, %c0_14] : memref<1x32x96xbf16, #tpu.memory_space<vmem>>, vector<1x32x96xbf16>
    %31 = vector.shape_cast %30 : vector<1x32x96xbf16> to vector<32x96xbf16>
    %32 = arith.truncf %29 : vector<4x32xf32> to vector<4x32xbf16>
    %cst_15 = arith.constant dense<0.000000e+00> : vector<4x96xf32>
    %33 = tpu.matmul %32, %31, %cst_15 {dimension_numbers = #tpu.dot_dimension_numbers<[1], [0], [0], [1], [0, 0, 1, 1], [], []>} : vector<4x32xbf16>, vector<32x96xbf16>, vector<4x96xf32> -> vector<4x96xf32>
    %c0_16 = arith.constant 0 : index
    %c0_17 = arith.constant 0 : index
    %c0_18 = arith.constant 0 : index
    %34 = vector.load %arg9[%c0_16, %c0_17, %c0_18] : memref<1x1x96xf32, #tpu.memory_space<vmem>>, vector<1x1x96xf32>
    %35 = vector.shape_cast %34 : vector<1x1x96xf32> to vector<1x96xf32>
    %36 = vector.broadcast %35 : vector<1x96xf32> to vector<4x96xf32>
    %37 = arith.addf %33, %36 : vector<4x96xf32>
    %38 = vector.extract_strided_slice %37 {offsets = [0, 0], sizes = [4, 32], strides = [1, 1]} : vector<4x96xf32> to vector<4x32xf32>
    %39 = vector.extract_strided_slice %37 {offsets = [0, 32], sizes = [4, 32], strides = [1, 1]} : vector<4x96xf32> to vector<4x32xf32>
    %40 = vector.extract_strided_slice %37 {offsets = [0, 64], sizes = [4, 32], strides = [1, 1]} : vector<4x96xf32> to vector<4x32xf32>
    %41 = vector.extract_strided_slice %38 {offsets = [0, 0], sizes = [4, 8], strides = [1, 1]} : vector<4x32xf32> to vector<4x8xf32>
    %cst_19 = arith.constant 0.353553385 : f32
    %42 = vector.broadcast %cst_19 : f32 to vector<4x8xf32>
    %43 = arith.mulf %41, %42 : vector<4x8xf32>
    %44 = vector.extract_strided_slice %39 {offsets = [0, 0], sizes = [4, 8], strides = [1, 1]} : vector<4x32xf32> to vector<4x8xf32>
    %45 = vector.extract_strided_slice %40 {offsets = [0, 0], sizes = [4, 8], strides = [1, 1]} : vector<4x32xf32> to vector<4x8xf32>
    %46 = arith.truncf %43 : vector<4x8xf32> to vector<4x8xbf16>
    %47 = arith.truncf %44 : vector<4x8xf32> to vector<4x8xbf16>
    %48 = tpu.transpose %47, [1, 0] : vector<4x8xbf16> -> vector<8x4xbf16>
    %cst_20 = arith.constant dense<0.000000e+00> : vector<4x4xf32>
    %49 = tpu.matmul %46, %48, %cst_20 {dimension_numbers = #tpu.dot_dimension_numbers<[1], [0], [0], [1], [0, 0, 1, 1], [], []>} : vector<4x8xbf16>, vector<8x4xbf16>, vector<4x4xf32> -> vector<4x4xf32>
    %cst_21 = arith.constant dense<0xFF800000> : vector<4xf32>
    %50 = vector.multi_reduction <maximumf>, %49, %cst_21 [1] : vector<4x4xf32> to vector<4xf32>
    %51 = vector.shape_cast %50 : vector<4xf32> to vector<4x1xf32>
    %52 = vector.broadcast %51 : vector<4x1xf32> to vector<4x4xf32>
    %53 = arith.subf %49, %52 : vector<4x4xf32>
    %54 = math.exp %53 : vector<4x4xf32>
    %cst_22 = arith.constant dense<0.000000e+00> : vector<4xf32>
    %55 = vector.multi_reduction <add>, %54, %cst_22 [1] : vector<4x4xf32> to vector<4xf32>
    %56 = vector.shape_cast %55 : vector<4xf32> to vector<4x1xf32>
    %57 = arith.truncf %54 : vector<4x4xf32> to vector<4x4xbf16>
    %58 = arith.truncf %45 : vector<4x8xf32> to vector<4x8xbf16>
    %cst_23 = arith.constant dense<0.000000e+00> : vector<4x8xf32>
    %59 = tpu.matmul %57, %58, %cst_23 {dimension_numbers = #tpu.dot_dimension_numbers<[1], [0], [0], [1], [0, 0, 1, 1], [], []>} : vector<4x4xbf16>, vector<4x8xbf16>, vector<4x8xf32> -> vector<4x8xf32>
    %60 = tpu.reciprocal %56 {approx = true} : vector<4x1xf32> -> vector<4x1xf32>
    %61 = vector.broadcast %60 : vector<4x1xf32> to vector<4x8xf32>
    %62 = arith.mulf %59, %61 : vector<4x8xf32>
    %63 = vector.extract_strided_slice %38 {offsets = [0, 8], sizes = [4, 8], strides = [1, 1]} : vector<4x32xf32> to vector<4x8xf32>
    %cst_24 = arith.constant 0.353553385 : f32
    %64 = vector.broadcast %cst_24 : f32 to vector<4x8xf32>
    %65 = arith.mulf %63, %64 : vector<4x8xf32>
    %66 = vector.extract_strided_slice %39 {offsets = [0, 8], sizes = [4, 8], strides = [1, 1]} : vector<4x32xf32> to vector<4x8xf32>
    %67 = vector.extract_strided_slice %40 {offsets = [0, 8], sizes = [4, 8], strides = [1, 1]} : vector<4x32xf32> to vector<4x8xf32>
    %68 = arith.truncf %65 : vector<4x8xf32> to vector<4x8xbf16>
    %69 = arith.truncf %66 : vector<4x8xf32> to vector<4x8xbf16>
    %70 = tpu.transpose %69, [1, 0] : vector<4x8xbf16> -> vector<8x4xbf16>
    %cst_25 = arith.constant dense<0.000000e+00> : vector<4x4xf32>
    %71 = tpu.matmul %68, %70, %cst_25 {dimension_numbers = #tpu.dot_dimension_numbers<[1], [0], [0], [1], [0, 0, 1, 1], [], []>} : vector<4x8xbf16>, vector<8x4xbf16>, vector<4x4xf32> -> vector<4x4xf32>
    %cst_26 = arith.constant dense<0xFF800000> : vector<4xf32>
    %72 = vector.multi_reduction <maximumf>, %71, %cst_26 [1] : vector<4x4xf32> to vector<4xf32>
    %73 = vector.shape_cast %72 : vector<4xf32> to vector<4x1xf32>
    %74 = vector.broadcast %73 : vector<4x1xf32> to vector<4x4xf32>
    %75 = arith.subf %71, %74 : vector<4x4xf32>
    %76 = math.exp %75 : vector<4x4xf32>
    %cst_27 = arith.constant dense<0.000000e+00> : vector<4xf32>
    %77 = vector.multi_reduction <add>, %76, %cst_27 [1] : vector<4x4xf32> to vector<4xf32>
    %78 = vector.shape_cast %77 : vector<4xf32> to vector<4x1xf32>
    %79 = arith.truncf %76 : vector<4x4xf32> to vector<4x4xbf16>
    %80 = arith.truncf %67 : vector<4x8xf32> to vector<4x8xbf16>
    %cst_28 = arith.constant dense<0.000000e+00> : vector<4x8xf32>
    %81 = tpu.matmul %79, %80, %cst_28 {dimension_numbers = #tpu.dot_dimension_numbers<[1], [0], [0], [1], [0, 0, 1, 1], [], []>} : vector<4x4xbf16>, vector<4x8xbf16>, vector<4x8xf32> -> vector<4x8xf32>
    %82 = tpu.reciprocal %78 {approx = true} : vector<4x1xf32> -> vector<4x1xf32>
    %83 = vector.broadcast %82 : vector<4x1xf32> to vector<4x8xf32>
    %84 = arith.mulf %81, %83 : vector<4x8xf32>
    %85 = vector.extract_strided_slice %38 {offsets = [0, 16], sizes = [4, 8], strides = [1, 1]} : vector<4x32xf32> to vector<4x8xf32>
    %cst_29 = arith.constant 0.353553385 : f32
    %86 = vector.broadcast %cst_29 : f32 to vector<4x8xf32>
    %87 = arith.mulf %85, %86 : vector<4x8xf32>
    %88 = vector.extract_strided_slice %39 {offsets = [0, 16], sizes = [4, 8], strides = [1, 1]} : vector<4x32xf32> to vector<4x8xf32>
    %89 = vector.extract_strided_slice %40 {offsets = [0, 16], sizes = [4, 8], strides = [1, 1]} : vector<4x32xf32> to vector<4x8xf32>
    %90 = arith.truncf %87 : vector<4x8xf32> to vector<4x8xbf16>
    %91 = arith.truncf %88 : vector<4x8xf32> to vector<4x8xbf16>
    %92 = tpu.transpose %91, [1, 0] : vector<4x8xbf16> -> vector<8x4xbf16>
    %cst_30 = arith.constant dense<0.000000e+00> : vector<4x4xf32>
    %93 = tpu.matmul %90, %92, %cst_30 {dimension_numbers = #tpu.dot_dimension_numbers<[1], [0], [0], [1], [0, 0, 1, 1], [], []>} : vector<4x8xbf16>, vector<8x4xbf16>, vector<4x4xf32> -> vector<4x4xf32>
    %cst_31 = arith.constant dense<0xFF800000> : vector<4xf32>
    %94 = vector.multi_reduction <maximumf>, %93, %cst_31 [1] : vector<4x4xf32> to vector<4xf32>
    %95 = vector.shape_cast %94 : vector<4xf32> to vector<4x1xf32>
    %96 = vector.broadcast %95 : vector<4x1xf32> to vector<4x4xf32>
    %97 = arith.subf %93, %96 : vector<4x4xf32>
    %98 = math.exp %97 : vector<4x4xf32>
    %cst_32 = arith.constant dense<0.000000e+00> : vector<4xf32>
    %99 = vector.multi_reduction <add>, %98, %cst_32 [1] : vector<4x4xf32> to vector<4xf32>
    %100 = vector.shape_cast %99 : vector<4xf32> to vector<4x1xf32>
    %101 = arith.truncf %98 : vector<4x4xf32> to vector<4x4xbf16>
    %102 = arith.truncf %89 : vector<4x8xf32> to vector<4x8xbf16>
    %cst_33 = arith.constant dense<0.000000e+00> : vector<4x8xf32>
    %103 = tpu.matmul %101, %102, %cst_33 {dimension_numbers = #tpu.dot_dimension_numbers<[1], [0], [0], [1], [0, 0, 1, 1], [], []>} : vector<4x4xbf16>, vector<4x8xbf16>, vector<4x8xf32> -> vector<4x8xf32>
    %104 = tpu.reciprocal %100 {approx = true} : vector<4x1xf32> -> vector<4x1xf32>
    %105 = vector.broadcast %104 : vector<4x1xf32> to vector<4x8xf32>
    %106 = arith.mulf %103, %105 : vector<4x8xf32>
    %107 = vector.extract_strided_slice %38 {offsets = [0, 24], sizes = [4, 8], strides = [1, 1]} : vector<4x32xf32> to vector<4x8xf32>
    %cst_34 = arith.constant 0.353553385 : f32
    %108 = vector.broadcast %cst_34 : f32 to vector<4x8xf32>
    %109 = arith.mulf %107, %108 : vector<4x8xf32>
    %110 = vector.extract_strided_slice %39 {offsets = [0, 24], sizes = [4, 8], strides = [1, 1]} : vector<4x32xf32> to vector<4x8xf32>
    %111 = vector.extract_strided_slice %40 {offsets = [0, 24], sizes = [4, 8], strides = [1, 1]} : vector<4x32xf32> to vector<4x8xf32>
    %112 = arith.truncf %109 : vector<4x8xf32> to vector<4x8xbf16>
    %113 = arith.truncf %110 : vector<4x8xf32> to vector<4x8xbf16>
    %114 = tpu.transpose %113, [1, 0] : vector<4x8xbf16> -> vector<8x4xbf16>
    %cst_35 = arith.constant dense<0.000000e+00> : vector<4x4xf32>
    %115 = tpu.matmul %112, %114, %cst_35 {dimension_numbers = #tpu.dot_dimension_numbers<[1], [0], [0], [1], [0, 0, 1, 1], [], []>} : vector<4x8xbf16>, vector<8x4xbf16>, vector<4x4xf32> -> vector<4x4xf32>
    %cst_36 = arith.constant dense<0xFF800000> : vector<4xf32>
    %116 = vector.multi_reduction <maximumf>, %115, %cst_36 [1] : vector<4x4xf32> to vector<4xf32>
    %117 = vector.shape_cast %116 : vector<4xf32> to vector<4x1xf32>
    %118 = vector.broadcast %117 : vector<4x1xf32> to vector<4x4xf32>
    %119 = arith.subf %115, %118 : vector<4x4xf32>
    %120 = math.exp %119 : vector<4x4xf32>
    %cst_37 = arith.constant dense<0.000000e+00> : vector<4xf32>
    %121 = vector.multi_reduction <add>, %120, %cst_37 [1] : vector<4x4xf32> to vector<4xf32>
    %122 = vector.shape_cast %121 : vector<4xf32> to vector<4x1xf32>
    %123 = arith.truncf %120 : vector<4x4xf32> to vector<4x4xbf16>
    %124 = arith.truncf %111 : vector<4x8xf32> to vector<4x8xbf16>
    %cst_38 = arith.constant dense<0.000000e+00> : vector<4x8xf32>
    %125 = tpu.matmul %123, %124, %cst_38 {dimension_numbers = #tpu.dot_dimension_numbers<[1], [0], [0], [1], [0, 0, 1, 1], [], []>} : vector<4x4xbf16>, vector<4x8xbf16>, vector<4x8xf32> -> vector<4x8xf32>
    %126 = tpu.reciprocal %122 {approx = true} : vector<4x1xf32> -> vector<4x1xf32>
    %127 = vector.broadcast %126 : vector<4x1xf32> to vector<4x8xf32>
    %128 = arith.mulf %125, %127 : vector<4x8xf32>
    %129 = tpu.concatenate %62, %84, %106, %128 in 1 : vector<4x8xf32>, vector<4x8xf32>, vector<4x8xf32>, vector<4x8xf32> -> vector<4x32xf32>
    %c0_39 = arith.constant 0 : index
    %c0_40 = arith.constant 0 : index
    %c0_41 = arith.constant 0 : index
    %130 = vector.load %arg10[%c0_39, %c0_40, %c0_41] : memref<1x32x32xbf16, #tpu.memory_space<vmem>>, vector<1x32x32xbf16>
    %131 = vector.shape_cast %130 : vector<1x32x32xbf16> to vector<32x32xbf16>
    %132 = arith.truncf %129 : vector<4x32xf32> to vector<4x32xbf16>
    %cst_42 = arith.constant dense<0.000000e+00> : vector<4x32xf32>
    %133 = tpu.matmul %132, %131, %cst_42 {dimension_numbers = #tpu.dot_dimension_numbers<[1], [0], [0], [1], [0, 0, 1, 1], [], []>} : vector<4x32xbf16>, vector<32x32xbf16>, vector<4x32xf32> -> vector<4x32xf32>
    %c0_43 = arith.constant 0 : index
    %c0_44 = arith.constant 0 : index
    %c0_45 = arith.constant 0 : index
    %134 = vector.load %arg11[%c0_43, %c0_44, %c0_45] : memref<1x1x32xf32, #tpu.memory_space<vmem>>, vector<1x1x32xf32>
    %135 = vector.shape_cast %134 : vector<1x1x32xf32> to vector<1x32xf32>
    %136 = vector.broadcast %135 : vector<1x32xf32> to vector<4x32xf32>
    %137 = arith.addf %133, %136 : vector<4x32xf32>
    %138 = arith.addf %3, %137 : vector<4x32xf32>
    %c0_46 = arith.constant 0 : index
    %c0_47 = arith.constant 0 : index
    %c0_48 = arith.constant 0 : index
    %139 = vector.load %arg12[%c0_46, %c0_47, %c0_48] : memref<1x1x32xf32, #tpu.memory_space<vmem>>, vector<1x1x32xf32>
    %140 = vector.shape_cast %139 : vector<1x1x32xf32> to vector<1x32xf32>
    %c0_49 = arith.constant 0 : index
    %c0_50 = arith.constant 0 : index
    %c0_51 = arith.constant 0 : index
    %141 = vector.load %arg13[%c0_49, %c0_50, %c0_51] : memref<1x1x32xf32, #tpu.memory_space<vmem>>, vector<1x1x32xf32>
    %142 = vector.shape_cast %141 : vector<1x1x32xf32> to vector<1x32xf32>
    %cst_52 = arith.constant dense<0.000000e+00> : vector<4xf32>
    %143 = vector.multi_reduction <add>, %138, %cst_52 [1] : vector<4x32xf32> to vector<4xf32>
    %144 = vector.shape_cast %143 : vector<4xf32> to vector<4x1xf32>
    %cst_53 = arith.constant 3.200000e+01 : f32
    %145 = vector.broadcast %cst_53 : f32 to vector<4x1xf32>
    %146 = arith.divf %144, %145 : vector<4x1xf32>
    %147 = vector.broadcast %146 : vector<4x1xf32> to vector<4x32xf32>
    %148 = arith.subf %138, %147 : vector<4x32xf32>
    %149 = arith.mulf %148, %148 : vector<4x32xf32>
    %cst_54 = arith.constant dense<0.000000e+00> : vector<4xf32>
    %150 = vector.multi_reduction <add>, %149, %cst_54 [1] : vector<4x32xf32> to vector<4xf32>
    %151 = vector.shape_cast %150 : vector<4xf32> to vector<4x1xf32>
    %cst_55 = arith.constant 3.200000e+01 : f32
    %152 = vector.broadcast %cst_55 : f32 to vector<4x1xf32>
    %153 = arith.divf %151, %152 : vector<4x1xf32>
    %154 = vector.broadcast %146 : vector<4x1xf32> to vector<4x32xf32>
    %155 = arith.subf %138, %154 : vector<4x32xf32>
    %cst_56 = arith.constant 9.99999974E-6 : f32
    %156 = vector.broadcast %cst_56 : f32 to vector<4x1xf32>
    %157 = arith.addf %153, %156 : vector<4x1xf32>
    %158 = math.rsqrt %157 : vector<4x1xf32>
    %159 = vector.broadcast %158 : vector<4x1xf32> to vector<4x32xf32>
    %160 = arith.mulf %155, %159 : vector<4x32xf32>
    %161 = vector.broadcast %140 : vector<1x32xf32> to vector<4x32xf32>
    %162 = arith.mulf %160, %161 : vector<4x32xf32>
    %163 = vector.broadcast %142 : vector<1x32xf32> to vector<4x32xf32>
    %164 = arith.addf %162, %163 : vector<4x32xf32>
    %c0_57 = arith.constant 0 : index
    %c0_58 = arith.constant 0 : index
    %c0_59 = arith.constant 0 : index
    %165 = vector.load %arg14[%c0_57, %c0_58, %c0_59] : memref<1x32x128xbf16, #tpu.memory_space<vmem>>, vector<1x32x128xbf16>
    %166 = vector.shape_cast %165 : vector<1x32x128xbf16> to vector<32x128xbf16>
    %167 = arith.truncf %164 : vector<4x32xf32> to vector<4x32xbf16>
    %cst_60 = arith.constant dense<0.000000e+00> : vector<4x128xf32>
    %168 = tpu.matmul %167, %166, %cst_60 {dimension_numbers = #tpu.dot_dimension_numbers<[1], [0], [0], [1], [0, 0, 1, 1], [], []>} : vector<4x32xbf16>, vector<32x128xbf16>, vector<4x128xf32> -> vector<4x128xf32>
    %c0_61 = arith.constant 0 : index
    %c0_62 = arith.constant 0 : index
    %c0_63 = arith.constant 0 : index
    %169 = vector.load %arg15[%c0_61, %c0_62, %c0_63] : memref<1x1x128xf32, #tpu.memory_space<vmem>>, vector<1x1x128xf32>
    %170 = vector.shape_cast %169 : vector<1x1x128xf32> to vector<1x128xf32>
    %171 = vector.broadcast %170 : vector<1x128xf32> to vector<4x128xf32>
    %172 = arith.addf %168, %171 : vector<4x128xf32>
    %173 = arith.mulf %172, %172 : vector<4x128xf32>
    %174 = arith.mulf %172, %173 : vector<4x128xf32>
    %cst_64 = arith.constant 4.471500e-02 : f32
    %175 = vector.broadcast %cst_64 : f32 to vector<4x128xf32>
    %176 = arith.mulf %175, %174 : vector<4x128xf32>
    %177 = arith.addf %172, %176 : vector<4x128xf32>
    %cst_65 = arith.constant 0.797884583 : f32
    %178 = vector.broadcast %cst_65 : f32 to vector<4x128xf32>
    %179 = arith.mulf %178, %177 : vector<4x128xf32>
    %180 = math.tanh %179 : vector<4x128xf32>
    %cst_66 = arith.constant 1.000000e+00 : f32
    %181 = vector.broadcast %cst_66 : f32 to vector<4x128xf32>
    %182 = arith.addf %181, %180 : vector<4x128xf32>
    %cst_67 = arith.constant 5.000000e-01 : f32
    %183 = vector.broadcast %cst_67 : f32 to vector<4x128xf32>
    %184 = arith.mulf %183, %182 : vector<4x128xf32>
    %185 = arith.mulf %172, %184 : vector<4x128xf32>
    %c0_68 = arith.constant 0 : index
    %c0_69 = arith.constant 0 : index
    %c0_70 = arith.constant 0 : index
    %186 = vector.load %arg16[%c0_68, %c0_69, %c0_70] : memref<1x128x32xbf16, #tpu.memory_space<vmem>>, vector<1x128x32xbf16>
    %187 = vector.shape_cast %186 : vector<1x128x32xbf16> to vector<128x32xbf16>
    %188 = arith.truncf %185 : vector<4x128xf32> to vector<4x128xbf16>
    %cst_71 = arith.constant dense<0.000000e+00> : vector<4x32xf32>
    %189 = tpu.matmul %188, %187, %cst_71 {dimension_numbers = #tpu.dot_dimension_numbers<[1], [0], [0], [1], [0, 0, 1, 1], [], []>} : vector<4x128xbf16>, vector<128x32xbf16>, vector<4x32xf32> -> vector<4x32xf32>
    %c0_72 = arith.constant 0 : index
    %c0_73 = arith.constant 0 : index
    %c0_74 = arith.constant 0 : index
    %190 = vector.load %arg17[%c0_72, %c0_73, %c0_74] : memref<1x1x32xf32, #tpu.memory_space<vmem>>, vector<1x1x32xf32>
    %191 = vector.shape_cast %190 : vector<1x1x32xf32> to vector<1x32xf32>
    %192 = vector.broadcast %191 : vector<1x32xf32> to vector<4x32xf32>
    %193 = arith.addf %189, %192 : vector<4x32xf32>
    %194 = arith.addf %138, %193 : vector<4x32xf32>
    %c0_75 = arith.constant 0 : index
    %c0_76 = arith.constant 0 : index
    %195 = vector.load %arg19[%c0_75, %c0_76] : memref<4x32xf32, #tpu.memory_space<vmem>>, vector<4x32xf32>
    tpu.vector_store %arg19[%c0_75, %c0_76], %194 {strides = array<i32>} : memref<4x32xf32, #tpu.memory_space<vmem>>, vector<4x32xf32>,
    %c1_i32 = arith.constant 1 : i32
    %196 = arith.cmpi eq, %arg1, %c1_i32 : i32
    %197 = arith.extui %196 : i1 to i32
    %c0_i32_77 = arith.constant 0 : i32
    %198 = arith.cmpi ne, %197, %c0_i32_77 : i32
    scf.if %198 {
      %c0_78 = arith.constant 0 : index
      %c0_79 = arith.constant 0 : index
      %199 = vector.load %arg19[%c0_78, %c0_79] : memref<4x32xf32, #tpu.memory_space<vmem>>, vector<4x32xf32>
      %c0_80 = arith.constant 0 : index
      %c0_81 = arith.constant 0 : index
      %c0_82 = arith.constant 0 : index
      %200 = vector.load %arg18[%c0_80, %c0_81, %c0_82] : memref<1x4x32xf32, #tpu.memory_space<vmem>>, vector<1x4x32xf32>
      %201 = vector.shape_cast %200 : vector<1x4x32xf32> to vector<4x32xf32>
      %202 = vector.shape_cast %199 : vector<4x32xf32> to vector<1x4x32xf32>
      tpu.vector_store %arg18[%c0_80, %c0_81, %c0_82], %202 {strides = array<i32>} : memref<1x4x32xf32, #tpu.memory_space<vmem>>, vector<1x4x32xf32>,
    } else {
    }
    return
  }
  func.func @transform_0(%arg0: i32, %arg1: i32) -> (i32, i32, i32) {
    %c0_i32 = arith.constant 0 : i32
    %c0_i32_0 = arith.constant 0 : i32
    %c0_i32_1 = arith.constant 0 : i32
    return %arg0, %c0_i32, %c0_i32_0 : i32, i32, i32
  }
  func.func @transform_1(%arg0: i32, %arg1: i32) -> (i32, i32) {
    %c0_i32 = arith.constant 0 : i32
    %c0_i32_0 = arith.constant 0 : i32
    %c0_i32_1 = arith.constant 0 : i32
    return %c0_i32, %c0_i32_0 : i32, i32
  }
  func.func @transform_2(%arg0: i32, %arg1: i32) -> (i32, i32) {
    %c0_i32 = arith.constant 0 : i32
    %c0_i32_0 = arith.constant 0 : i32
    %c0_i32_1 = arith.constant 0 : i32
    return %c0_i32, %c0_i32_0 : i32, i32
  }
  func.func @transform_3(%arg0: i32, %arg1: i32) -> (i32, i32) {
    %c0_i32 = arith.constant 0 : i32
    %c0_i32_0 = arith.constant 0 : i32
    %c0_i32_1 = arith.constant 0 : i32
    return %c0_i32, %c0_i32_0 : i32, i32
  }
  func.func @transform_4(%arg0: i32, %arg1: i32) -> (i32, i32, i32) {
    %c0_i32 = arith.constant 0 : i32
    %c0_i32_0 = arith.constant 0 : i32
    %c0_i32_1 = arith.constant 0 : i32
    return %arg1, %c0_i32, %c0_i32_0 : i32, i32, i32
  }
  func.func @transform_5(%arg0: i32, %arg1: i32) -> (i32, i32, i32) {
    %c0_i32 = arith.constant 0 : i32
    %c0_i32_0 = arith.constant 0 : i32
    %c0_i32_1 = arith.constant 0 : i32
    return %arg1, %c0_i32, %c0_i32_0 : i32, i32, i32
  }
  func.func @transform_6(%arg0: i32, %arg1: i32) -> (i32, i32, i32) {
    %c0_i32 = arith.constant 0 : i32
    %c0_i32_0 = arith.constant 0 : i32
    %c0_i32_1 = arith.constant 0 : i32
    return %arg1, %c0_i32, %c0_i32_0 : i32, i32, i32
  }
  func.func @transform_7(%arg0: i32, %arg1: i32) -> (i32, i32, i32) {
    %c0_i32 = arith.constant 0 : i32
    %c0_i32_0 = arith.constant 0 : i32
    %c0_i32_1 = arith.constant 0 : i32
    return %arg1, %c0_i32, %c0_i32_0 : i32, i32, i32
  }
  func.func @transform_8(%arg0: i32, %arg1: i32) -> (i32, i32, i32) {
    %c0_i32 = arith.constant 0 : i32
    %c0_i32_0 = arith.constant 0 : i32
    %c0_i32_1 = arith.constant 0 : i32
    return %arg1, %c0_i32, %c0_i32_0 : i32, i32, i32
  }
  func.func @transform_9(%arg0: i32, %arg1: i32) -> (i32, i32, i32) {
    %c0_i32 = arith.constant 0 : i32
    %c0_i32_0 = arith.constant 0 : i32
    %c0_i32_1 = arith.constant 0 : i32
    return %arg1, %c0_i32, %c0_i32_0 : i32, i32, i32
  }
  func.func @transform_10(%arg0: i32, %arg1: i32) -> (i32, i32, i32) {
    %c0_i32 = arith.constant 0 : i32
    %c0_i32_0 = arith.constant 0 : i32
    %c0_i32_1 = arith.constant 0 : i32
    return %arg1, %c0_i32, %c0_i32_0 : i32, i32, i32
  }
  func.func @transform_11(%arg0: i32, %arg1: i32) -> (i32, i32, i32) {
    %c0_i32 = arith.constant 0 : i32
    %c0_i32_0 = arith.constant 0 : i32
    %c0_i32_1 = arith.constant 0 : i32
    return %arg1, %c0_i32, %c0_i32_0 : i32, i32, i32
  }
  func.func @transform_12(%arg0: i32, %arg1: i32) -> (i32, i32, i32) {
    %c0_i32 = arith.constant 0 : i32
    %c0_i32_0 = arith.constant 0 : i32
    %c0_i32_1 = arith.constant 0 : i32
    return %arg1, %c0_i32, %c0_i32_0 : i32, i32, i32
  }
  func.func @transform_13(%arg0: i32, %arg1: i32) -> (i32, i32, i32) {
    %c0_i32 = arith.constant 0 : i32
    %c0_i32_0 = arith.constant 0 : i32
    %c0_i32_1 = arith.constant 0 : i32
    return %arg1, %c0_i32, %c0_i32_0 : i32, i32, i32
  }
  func.func @transform_14(%arg0: i32, %arg1: i32) -> (i32, i32, i32) {
    %c0_i32 = arith.constant 0 : i32
    %c0_i32_0 = arith.constant 0 : i32
    %c0_i32_1 = arith.constant 0 : i32
    return %arg1, %c0_i32, %c0_i32_0 : i32, i32, i32
  }
  func.func @transform_15(%arg0: i32, %arg1: i32) -> (i32, i32, i32) {
    %c0_i32 = arith.constant 0 : i32
    %c0_i32_0 = arith.constant 0 : i32
    %c0_i32_1 = arith.constant 0 : i32
    return %arg1, %c0_i32, %c0_i32_0 : i32, i32, i32
  }
  func.func @transform_16(%arg0: i32, %arg1: i32) -> (i32, i32, i32) {
    %c0_i32 = arith.constant 0 : i32
    %c0_i32_0 = arith.constant 0 : i32
    %c0_i32_1 = arith.constant 0 : i32
    return %arg0, %c0_i32, %c0_i32_0 : i32, i32, i32
  }
}

</mosaic_0001>

<bundles_post_ra>
// kernel: masked_autoencoder_forward.3
= control target key start
LH: loop header
LB: loop body
LE: loop exit
PB: predicated region body
PF: predicated region fallthrough
CT: control target
= control target key end

     0   :  { %s2464_s24 = smov 0   ;;  %s2466_s25 = smov 0   ;;  %s2726_s0 = inlined_call_operand.vmem [shape: f32[2,4,32], index: 0, kind: input, shape index: {}]   ;;  %s2727_s1 = inlined_call_operand.vmem [shape: f32[1,32], index: 1, kind: input, shape index: {}]   ;;  %s2728_s2 = inlined_call_operand.vmem [shape: f32[16,32], index: 2, kind: input, shape index: {}]   ;;  %s2729_s3 = inlined_call_operand.vmem [shape: f32[1,1,32], index: 3, kind: input, shape index: {}]   ;;  %s2730_s4 = inlined_call_operand.vmem [shape: f32[1,1,32], index: 4, kind: input, shape index: {}]   ;;  %s2731_s5 = inlined_call_operand.vmem [shape: bf16[1,32,96], index: 5, kind: input, shape index: {}]   ;;  %s2732_s6 = inlined_call_operand.vmem [shape: f32[1,1,96], index: 6, kind: input, shape index: {}]   ;;  %s2733_s7 = inlined_call_operand.vmem [shape: bf16[1,32,32], index: 7, kind: input, shape index: {}]   ;;  %s2734_s8 = inlined_call_operand.vmem [shape: f32[1,1,32], index: 8, kind: input, shape index: {}]   ;;  %s2735_s9 = inlined_call_operand.vmem [shape: f32[1,1,32], index: 9, kind: input, shape index: {}]   ;;  %s2736_s10 = inlined_call_operand.vmem [shape: f32[1,1,32], index: 10, kind: input, shape index: {}]   ;;  %s2737_s11 = inlined_call_operand.vmem [shape: bf16[1,32,128], index: 11, kind: input, shape index: {}]   ;;  %s2738_s12 = inlined_call_operand.vmem [shape: f32[1,1,128], index: 12, kind: input, shape index: {}]   ;;  %s2739_s13 = inlined_call_operand.vmem [shape: bf16[1,128,32], index: 13, kind: input, shape index: {}]   ;;  %s2740_s14 = inlined_call_operand.vmem [shape: f32[1,1,32], index: 14, kind: input, shape index: {}]   ;;  %s2741_s15 = inlined_call_operand.vmem [shape: bf16[32,16], index: 15, kind: input, shape index: {}]   ;;  %s2742_s16 = inlined_call_operand.vmem [shape: f32[1,16], index: 16, kind: input, shape index: {}]   ;;  %s2743_s17 = inlined_call_operand.vmem [shape: f32[2,16,16], index: 17, kind: output, shape index: {}]  }
   0x1   :  { %2744 = sst [smem:[#allocation3_spill]] %s2726_s0  ;;  %s2468_s26 = smov 0  }
   0x2   :  { %2745 = sst [smem:[#allocation4_spill]] %s2727_s1 }
   0x3 LB: > { %s39_s27 = sadd.s32 1, %s2352_s25  ;;  %p2037_p0 = scmp.ge.s32.totalorder %s2356_s26, 1  ;;  %s2356_s26 = sphi %s2468_s26, %s27_s26   ;;  %s2352_s25 = sphi %s2466_s25, %s2749_s25   ;;  %s2348_s24 = sphi %s2464_s24, %s2748_s24  }
   0x4   : > { %p41_p1 = scmp.ge.s32.totalorder %s39_s27, 2  ;;  %p602_p2 = scmp.lt.s32.totalorder %s2356_s26, 3 }
   0x6   : > { %s2751_s27 = smov (%p41_p1, %s39_s27), 0  ;;  %p603_p3 = pnand %p2037_p0, %p602_p2 }
   0x7   : > { %p697_p4 = scmp.lt.s32.totalorder (!%p603_p3), %s2348_s24, 1  ;;  %s2746_s0 = sld [smem:[#allocation4_spill]] (!%p603_p3) }
   0x8   : > { %606 = sbr.rel (%p603_p3) target bundleno = 2553 (0x9f9), region = 88  ;;  %s2747_s23 = sld [smem:[#allocation3_spill]] (!%p603_p3) }
   0x9   : > { %s2361_s29 = smov (!%p603_p3), 96   ;;  %s2363_s30 = smov (!%p603_p3), 120  }
   0xa   : > { %s2364_s18 = smov (!%p603_p3), 104   ;;  %s2366_s1 = smov (!%p603_p3), 72  }
   0xb   : > { %s2367_s20 = smov (!%p603_p3), 64   ;;  %s2368_s21 = smov (!%p603_p3), 56  }
   0xc   : > { %s2369_s22 = smov (!%p603_p3), 48  }
   0xd   : > { %v2041_v0 = vld [vmem:[%s2746_s0] ss:$0 sm:$0xff]  ;;  %vm763_vm0 = vcmask 1043456   ;;  %v766_v1 = vld [vmem:[%s2728_s2 + $0x8] sm:$0xff]  ;;  %s2753_s24 = smov (!%p697_p4, %s2348_s24), 1  ;;  %vm769_vm1 = vcmask 261120  }
   0xe   : > { %v768_v2 = vadd.f32 %v2041_v0, %v766_v1  ;;  %s2038_s19 = sshll.u32 %s2753_s24, 2  ;;  %v765_v3 = vld [vmem:[%s2728_s2] sm:$0xff]  ;;  %v2274_v21 = vld [vmem:[%s2731_s5 + $0x8] sm:$0xff]   ;;  %v2358_v22 = vmov 0.0   ;;  %vm2359_vm2 = vmmov 0   ;;  %s2362_s0 = smov 112  }
   0xf   : > { %s700_s28 = scalar_lea.vmem %s2747_s23, %s2038_s19  ;;  %2119 = vmatprep.subr.bf16.mxu0 %v2358_v22  ;;  %2123 = vmatprep.mubr.msk.bf16.mxu0 %vm2359_vm2, %v2358_v22  ;;  %v2275_v23 = vld [vmem:[%s2731_s5] sm:$0xff]   ;;  %s2365_s19 = smov 80   ;;  %vm895_vm3 = vcmask 64512   ;;  %vm943_vm4 = vcmask 130048   ;;  %vm1406_vm5 = vcmask 195584  }
  0x10   : > { %771 = vst.msk [vmem:[#allocation2 + $0x8] sm:$0xff] %vm769_vm1, %v768_v2  ;;  %v755_v4 = vld [vmem:[%s700_s28] sm:$0xf]  ;;  %2120 = vmatpush3.bf16.msra.mxu0 %v2274_v21  ;;  %2139 = vmatprep.subr.bf16.mxu1 %v2358_v22  ;;  %s2360_s28 = smov 88   ;;  %s2370_s23 = smov 40  }
  0x11   : > { %v764_v5 = vsel %vm763_vm0, %v755_v4, %v2041_v0  ;;  %2121 = vmatprep.subr.bf16.mxu0 %v2358_v22  ;;  %2141 = vmatprep.mubr.msk.bf16.mxu1 %vm2359_vm2, %v2358_v22  ;;  %v2042_v32 = vld [vmem:[%s2729_s3] ss:$0 sm:$0xff] }
  0x12   : > { %v767_v6 = vadd.f32 %v765_v3, %v764_v5  ;;  %v2043_v36 = vld [vmem:[%s2730_s4] ss:$0 sm:$0xff] }
  0x13   : > { %v2044_v42 = vld [vmem:[%s2732_s6] ss:$0 sm:$0xff] }
  0x14   : > { %770 = vst.msk [vmem:[#allocation2] sm:$0xff] %vm769_vm1, %v767_v6  ;;  %2122 = vmatpush3.bf16.msra.mxu0 %v2275_v23 }
  0x15   : > { %2127 = vmatprep.subr.bf16.mxu0 %v2358_v22 }
  0x17   : > { %v2501_v8 = vld [vmem:[#allocation2 + $0x8] sm:$0xff] }
  0x18   : > { %v780_v10 = vsel %vm769_vm1, %v2501_v8, 0.0 }
  0x1b   : > { %v2499_v7 = vld [vmem:[#allocation2] sm:$0xff] }
  0x1c   : > { %v777_v9 = vsel %vm769_vm1, %v2499_v7, 0.0 }
  0x1d   : > { %778 = vadd.xlane.f32.xlu0 %v777_v9 }
  0x21   : > { %781 = vadd.xlane.f32.xlu0 %v780_v10 }
  0xa6   : > { %v779_v11 = vpop.xlane.xlu0 %778 }
  0xa7   : > { %v784_v12 = vmul.f32 0.03125, %v779_v11 }
  0xa9   : > { %v786_v13 = vsub.f32 %v2499_v7, %v784_v12 }
  0xaa   : > { %v782_v14 = vpop.xlane.xlu0 %781 }
  0xab   : > { %v785_v15 = vmul.f32 0.03125, %v782_v14  ;;  %v788_v16 = vmul.f32 %v786_v13, %v786_v13 }
  0xad   : > { %v787_v17 = vsub.f32 %v2501_v8, %v785_v15  ;;  %v790_v18 = vsel %vm769_vm1, %v788_v16, 0.0 }
  0xae   : > { %791 = vadd.xlane.f32.xlu1 %v790_v18 }
  0xaf   : > { %v789_v19 = vmul.f32 %v787_v17, %v787_v17 }
  0xb1   : > { %v793_v20 = vsel %vm769_vm1, %v789_v19, 0.0 }
  0xb2   : > { %794 = vadd.xlane.f32.xlu1 %v793_v20 }
 0x137   : > { %v792_v24 = vpop.xlane.xlu1 %791 }
 0x138   : > { %v796_v25 = vmul.f32 0.03125, %v792_v24 }
 0x13a   : > { %v798_v26 = vadd.f32 1e-05, %v796_v25 }
 0x13b   : > { %v795_v27 = vpop.xlane.xlu1 %794 }
 0x13c   : > { %2290 = vrsqrt.f32 %v798_v26  ;;  %v797_v28 = vmul.f32 0.03125, %v795_v27 }
 0x13e   : > { %v799_v29 = vadd.f32 1e-05, %v797_v28 }
 0x140   : > { %2292 = vrsqrt.f32 %v799_v29 }
 0x149   : > { %v2291_v30 = vpop.eup %2290 }
 0x14a   : > { %v802_v31 = vmul.f32 %v2291_v30, %v786_v13 }
 0x14c   : > { %v810_v35 = vmul.f32 %v2042_v32, %v802_v31 }
 0x14d   : > { %v2293_v33 = vpop.eup %2292 }
 0x14e   : > { %v803_v34 = vmul.f32 %v2293_v33, %v787_v17  ;;  %v818_v38 = vadd.f32 %v2043_v36, %v810_v35 }
 0x150   : > { %v811_v37 = vmul.f32 %v2042_v32, %v803_v34 }
 0x152   : > { %v819_v39 = vadd.f32 %v2043_v36, %v811_v37 }
 0x154   : > { %v824_v40 = vpack.c.bf16 %v819_v39, %v818_v38 }
 0x156   : > { %2124 = vmatmul.mubr.msk.bf16.vlgmr.msra.gmra.mxu0 %vm769_vm1, %v824_v40 }
 0x157   : > { %2129 = vmatprep.mubr.msk.bf16.mxu0 %vm2359_vm2, %v2358_v22 }
 0x216   : > { %v881_v41 = vpop.f32.mrf.mxu0 }
 0x217   : > { %v882_v45 = vadd.f32 %v2044_v42, %v881_v41 }
 0x218   : > { %v2125_v43 = vpop.f32.mrf.mxu0 }
 0x219   : > { %v888_v50 = vmul.f32 0.35355338, %v882_v45 }
 0x21a   : > { %v884_v44 = vpop.f32.mrf.mxu0 }
 0x21b   : > { %v885_v46 = vadd.f32 %v2044_v42, %v884_v44 }
 0x21c   : > { %v2126_v47 = vpop.f32.mrf.mxu0 }
 0x21d   : > { %v889_v48 = vmul.f32 0.35355338, %v885_v46  ;;  %v2537_v49 = vpack.c.bf16 %v885_v46, %v882_v45 }
 0x21f   : > { %1017 = vrot.lane.b32.xlu1 %v2537_v49, %s2360_s28  ;;  %893 = vrot.lane.b32.xlu0 %v2537_v49, %s2361_s29  ;;  %v890_v51 = vpack.c.bf16 %v889_v48, %v888_v50  ;;  %s2371_s28 = smov 8  }
 0x223   : > { %1136 = vrot.lane.b32.xlu0 %v890_v51, %s2362_s0  ;;  %1015 = vrot.lane.b32.xlu1 %v890_v51, %s2363_s30 }
 0x227   : > { %1257 = vrot.lane.b32.xlu0 %v890_v51, %s2364_s18  ;;  %1138 = vrot.lane.b32.xlu1 %v2537_v49, %s2365_s19  ;;  %s2372_s19 = smov 16  }
 0x22b   : > { %1259 = vrot.lane.b32.xlu1 %v2537_v49, %s2366_s1  ;;  %s2373_s1 = smov 24  }
 0x291   : > { %v1018_v52 = vpop.permute.xlu1 %1017  ;;  %v894_v53 = vpop.permute.xlu0 %893 }
 0x292   : > { %v900_v54 = vsel %vm895_vm3, %v894_v53, 0  ;;  %v1023_v55 = vsel %vm895_vm3, %v1018_v52, 0 }
 0x293   : > { %2128 = vmatpush3.bf16.xpose.msra.mxu0 %v900_v54  ;;  %2140 = vmatpush3.bf16.xpose.msra.mxu1 %v1023_v55 }
 0x294   : > { %2151 = vmatprep.subr.bf16.mxu1 %v2358_v22  ;;  %2133 = vmatprep.subr.bf16.mxu0 %v2358_v22 }
 0x295   : > { %v1016_v56 = vpop.permute.xlu1 %1015  ;;  %v1137_v60 = vpop.permute.xlu0 %1136 }
 0x299   : > { %v1139_v57 = vpop.permute.xlu1 %1138  ;;  %v1258_v62 = vpop.permute.xlu0 %1257 }
 0x29a   : > { %v1144_v58 = vsel %vm895_vm3, %v1139_v57, 0  ;;  %2130 = vmatmul.mubr.msk.bf16.vlgmr.msra.gmra.mxu0 %vm895_vm3, %v890_v51  ;;  %2142 = vmatmul.mubr.msk.bf16.vlgmr.msra.gmra.mxu1 %vm895_vm3, %v1016_v56 }
 0x29b   : > { %2152 = vmatpush3.bf16.xpose.msra.mxu1 %v1144_v58  ;;  %2153 = vmatprep.mubr.msk.bf16.mxu1 %vm2359_vm2, %v2358_v22 }
 0x29c   : > { %2163 = vmatprep.subr.bf16.mxu1 %v2358_v22  ;;  %2135 = vmatprep.mubr.msk.bf16.mxu0 %vm2359_vm2, %v2358_v22 }
 0x29d   : > { %v1260_v59 = vpop.permute.xlu1 %1259 }
 0x29e   : > { %v1265_v61 = vsel %vm895_vm3, %v1260_v59, 0 }
 0x2a2   : > { %2154 = vmatmul.mubr.msk.bf16.vlgmr.msra.gmra.mxu1 %vm895_vm3, %v1137_v60 }
 0x2a3   : > { %2164 = vmatpush3.bf16.xpose.msra.mxu1 %v1265_v61  ;;  %2165 = vmatprep.mubr.msk.bf16.mxu1 %vm2359_vm2, %v2358_v22 }
 0x2a4   : > { %2175 = vmatprep.subr.bf16.mxu1 %v2358_v22 }
 0x2aa   : > { %2166 = vmatmul.mubr.msk.bf16.vlgmr.msra.gmra.mxu1 %vm895_vm3, %v1258_v62 }
 0x2ab   : > { %2179 = vmatprep.mubr.msk.bf16.mxu1 %vm2359_vm2, %v2358_v22 }
 0x35a   : > { %v936_v63 = vpop.f32.mrf.mxu0  ;;  %v1059_v0 = vpop.f32.mrf.mxu1 }
 0x35b   : > { %v1066_v1 = vsel %vm943_vm4, %v1059_v0, -inf  ;;  %v944_v2 = vsel %vm943_vm4, %v936_v63, -inf }
 0x35c   : > { %1067 = vmax.xlane.f32.xlu0 %v1066_v1  ;;  %v2143_v3 = vpop.f32.mrf.mxu1  ;;  %945 = vmax.xlane.f32.xlu1 %v944_v2  ;;  %v2131_v4 = vpop.f32.mrf.mxu0 }
 0x35e   : > { %v939_v5 = vpop.f32.mrf.mxu0  ;;  %v1062_v6 = vpop.f32.mrf.mxu1 }
 0x35f   : > { %v947_v9 = vsel %vm943_vm4, %v939_v5, -inf  ;;  %v1069_v13 = vsel %vm943_vm4, %v1062_v6, -inf }
 0x360   : > { %v2144_v10 = vpop.f32.mrf.mxu1  ;;  %948 = vmax.xlane.f32.xlu0 %v947_v9  ;;  %v2132_v11 = vpop.f32.mrf.mxu0 }
 0x362   : > { %v2566_v12 = vpop.f32.mrf.mxu1 }
 0x363   : > { %v1187_v24 = vsel %vm943_vm4, %v2566_v12, -inf }
 0x364   : > { %v2155_v14 = vpop.f32.mrf.mxu1  ;;  %1070 = vmax.xlane.f32.xlu0 %v1069_v13 }
 0x366   : > { %v1183_v15 = vpop.f32.mrf.mxu1 }
 0x367   : > { %v1190_v16 = vsel %vm943_vm4, %v1183_v15, -inf }
 0x368   : > { %v2156_v17 = vpop.f32.mrf.mxu1  ;;  %1191 = vmax.xlane.f32.xlu0 %v1190_v16 }
 0x36a   : > { %v2570_v18 = vpop.f32.mrf.mxu1 }
 0x36b   : > { %v1308_v25 = vsel %vm943_vm4, %v2570_v18, -inf }
 0x36c   : > { %v2167_v19 = vpop.f32.mrf.mxu1 }
 0x36d   : > { %963 = vrot.lane.b32.xlu1 %v2537_v49, %s2367_s20 }
 0x36e   : > { %v1304_v20 = vpop.f32.mrf.mxu1 }
 0x36f   : > { %v1311_v21 = vsel %vm943_vm4, %v1304_v20, -inf }
 0x370   : > { %v2168_v23 = vpop.f32.mrf.mxu1  ;;  %1312 = vmax.xlane.f32.xlu0 %v1311_v21 }
 0x386   : > { %1085 = vrot.lane.b32.xlu0 %v2537_v49, %s2368_s21  ;;  %s2081_s21 = sshll.u32 %s2753_s24, 4 }
 0x387   : > { %s749_s0 = scalar_lea.vmem %s2743_s17, %s2081_s21 }
 0x391   : > { %1188 = vmax.xlane.f32.xlu1 %v1187_v24 }
 0x395   : > { %1309 = vmax.xlane.f32.xlu1 %v1308_v25 }
 0x3a6   : > { %1206 = vrot.lane.b32.xlu1 %v2537_v49, %s2369_s22 }
 0x3aa   : > { %1327 = vrot.lane.b32.xlu1 %v2537_v49, %s2370_s23 }
 0x3e5   : > { %v1068_v26 = vpop.xlane.xlu0 %1067  ;;  %v946_v27 = vpop.xlane.xlu1 %945 }
 0x3e6   : > { %v1072_v28 = vsub.f32 %v1059_v0, %v1068_v26  ;;  %v950_v29 = vsub.f32 %v936_v63, %v946_v27 }
 0x3e8   : > { %v1074_v30 = vmul.f32 1.442695, %v1072_v28  ;;  %v952_v31 = vmul.f32 1.442695, %v950_v29 }
 0x3e9   : > { %v964_v32 = vpop.permute.xlu1 %963  ;;  %v949_v33 = vpop.xlane.xlu0 %948 }
 0x3ea   : > { %2294 = vpow2.f32 %v1074_v30  ;;  %v951_v34 = vsub.f32 %v939_v5, %v949_v33  ;;  %2134 = vmatpush3.bf16.msra.mxu0 %v964_v32  ;;  %v2276_v32 = vld [vmem:[%s2733_s7 + $0x8] sm:$0xff]  }
 0x3eb   : > { %2145 = vmatprep.subr.bf16.mxu0 %v2358_v22  ;;  %2296 = vpow2.f32 %v952_v31  ;;  %2176 = vmatpush3.bf16.msra.mxu1 %v2276_v32  ;;  %v2278_v32 = vld [vmem:[%s2737_s11 + $0x8] sm:$0xff]  }
 0x3ec   : > { %v954_v35 = vmul.f32 1.442695, %v951_v34  ;;  %2177 = vmatprep.subr.bf16.mxu1 %v2358_v22 }
 0x3ed   : > { %v1071_v36 = vpop.xlane.xlu0 %1070 }
 0x3ee   : > { %2298 = vpow2.f32 %v954_v35  ;;  %v1073_v37 = vsub.f32 %v1062_v6, %v1071_v36 }
 0x3f0   : > { %v1076_v38 = vmul.f32 1.442695, %v1073_v37 }
 0x3f1   : > { %v1192_v39 = vpop.xlane.xlu0 %1191 }
 0x3f2   : > { %2300 = vpow2.f32 %v1076_v38  ;;  %v1194_v50 = vsub.f32 %v1183_v15, %v1192_v39 }
 0x3f4   : > { %v1197_v51 = vmul.f32 1.442695, %v1194_v50 }
 0x3f6   : > { %2302 = vpow2.f32 %v1197_v51 }
 0x3f7   : > { %v2295_v40 = vpop.eup %2294 }
 0x3f8   : > { %v1078_v41 = vsel %vm943_vm4, %v2295_v40, 0.0  ;;  %v2297_v43 = vpop.eup %2296 }
 0x3f9   : > { %1079 = vadd.xlane.f32.xlu1 %v1078_v41  ;;  %v1313_v42 = vpop.xlane.xlu0 %1312  ;;  %v956_v6 = vsel %vm943_vm4, %v2297_v43, 0.0 }
 0x3fa   : > { %v1315_v54 = vsub.f32 %v1304_v20, %v1313_v42 }
 0x3fb   : > { %v2299_v44 = vpop.eup %2298 }
 0x3fc   : > { %v962_v45 = vpack.c.bf16 %v2299_v44, %v2297_v43  ;;  %v1318_v58 = vmul.f32 1.442695, %v1315_v54  ;;  %v959_v11 = vsel %vm943_vm4, %v2299_v44, 0.0 }
 0x3fd   : > { %v1086_v46 = vpop.permute.xlu0 %1085 }
 0x3fe   : > { %2136 = vmatmul.mubr.msk.bf16.vlgmr.msra.gmra.mxu0 %vm943_vm4, %v962_v45 }
 0x3ff   : > { %v2301_v47 = vpop.eup %2300  ;;  %2146 = vmatpush3.bf16.msra.mxu0 %v1086_v46  ;;  %2147 = vmatprep.mubr.msk.bf16.mxu0 %vm2359_vm2, %v2358_v22 }
 0x400   : > { %v1081_v48 = vsel %vm943_vm4, %v2301_v47, 0.0  ;;  %2157 = vmatprep.subr.bf16.mxu0 %v2358_v22  ;;  %v1084_v49 = vpack.c.bf16 %v2301_v47, %v2295_v40  ;;  %v2277_v40 = vld [vmem:[%s2733_s7] sm:$0xff]  }
 0x401   : > { %1082 = vadd.xlane.f32.xlu0 %v1081_v48  ;;  %2178 = vmatpush3.bf16.msra.mxu1 %v2277_v40 }
 0x402   : > { %2191 = vmatprep.subr.bf16.mxu1 %v2358_v22 }
 0x403   : > { %v2303_v61 = vpop.eup %2302 }
 0x404   : > { %v1202_v4 = vsel %vm943_vm4, %v2303_v61, 0.0 }
 0x406   : > { %2148 = vmatmul.mubr.msk.bf16.vlgmr.msra.gmra.mxu0 %vm943_vm4, %v1084_v49 }
 0x407   : > { %2159 = vmatprep.mubr.msk.bf16.mxu0 %vm2359_vm2, %v2358_v22 }
 0x41a   : > { %v1189_v52 = vpop.xlane.xlu1 %1188 }
 0x41b   : > { %v1193_v53 = vsub.f32 %v2566_v12, %v1189_v52 }
 0x41d   : > { %v1195_v55 = vmul.f32 1.442695, %v1193_v53 }
 0x41e   : > { %v1310_v56 = vpop.xlane.xlu1 %1309 }
 0x41f   : > { %2304 = vpow2.f32 %v1195_v55  ;;  %v1314_v57 = vsub.f32 %v2570_v18, %v1310_v56 }
 0x421   : > { %v1316_v59 = vmul.f32 1.442695, %v1314_v57 }
 0x422   : > { %v1207_v60 = vpop.permute.xlu1 %1206 }
 0x423   : > { %2306 = vpow2.f32 %v1316_v59  ;;  %2158 = vmatpush3.bf16.msra.mxu0 %v1207_v60 }
 0x424   : > { %2169 = vmatprep.subr.bf16.mxu0 %v2358_v22  ;;  %2308 = vpow2.f32 %v1318_v58 }
 0x426   : > { %v1328_v1 = vpop.permute.xlu1 %1327 }
 0x42c   : > { %v2305_v62 = vpop.eup %2304 }
 0x42d   : > { %v1199_v63 = vsel %vm943_vm4, %v2305_v62, 0.0  ;;  %v1205_v0 = vpack.c.bf16 %v2303_v61, %v2305_v62 }
 0x42e   : > { %1200 = vadd.xlane.f32.xlu0 %v1199_v63 }
 0x42f   : > { %2160 = vmatmul.mubr.msk.bf16.vlgmr.msra.gmra.mxu0 %vm943_vm4, %v1205_v0 }
 0x430   : > { %v2307_v2 = vpop.eup %2306  ;;  %2170 = vmatpush3.bf16.msra.mxu0 %v1328_v1  ;;  %2171 = vmatprep.mubr.msk.bf16.mxu0 %vm2359_vm2, %v2358_v22 }
 0x431   : > { %v1320_v3 = vsel %vm943_vm4, %v2307_v2, 0.0  ;;  %2183 = vmatprep.subr.bf16.mxu0 %v2358_v22  ;;  %v2309_v5 = vpop.eup %2308 }
 0x432   : > { %1321 = vadd.xlane.f32.xlu1 %v1320_v3  ;;  %1203 = vadd.xlane.f32.xlu0 %v1202_v4  ;;  %v1323_v9 = vsel %vm943_vm4, %v2309_v5, 0.0  ;;  %v1326_v10 = vpack.c.bf16 %v2309_v5, %v2307_v2 }
 0x436   : > { %957 = vadd.xlane.f32.xlu1 %v956_v6  ;;  %1324 = vadd.xlane.f32.xlu0 %v1323_v9 }
 0x437   : > { %2172 = vmatmul.mubr.msk.bf16.vlgmr.msra.gmra.mxu0 %vm943_vm4, %v1326_v10 }
 0x438   : > { %2187 = vmatprep.mubr.msk.bf16.mxu0 %vm2359_vm2, %v2358_v22  ;;  %2184 = vmatpush3.bf16.msra.mxu0 %v2278_v32 }
 0x439   : > { %2185 = vmatprep.subr.bf16.mxu0 %v2358_v22 }
 0x43a   : > { %960 = vadd.xlane.f32.xlu0 %v959_v11 }
 0x482   : > { %v1080_v12 = vpop.xlane.xlu1 %1079 }
 0x483   : > { %2310 = vrcp.f32 %v1080_v12  ;;  %v2056_v12 = vld [vmem:[%s2734_s8] ss:$0 sm:$0xff] }
 0x48a   : > { %v1083_v13 = vpop.xlane.xlu0 %1082 }
 0x48b   : > { %2312 = vrcp.f32 %v1083_v13 }
 0x490   : > { %v2311_v20 = vpop.eup %2310 }
 0x498   : > { %v2313_v21 = vpop.eup %2312 }
 0x4b7   : > { %v1201_v28 = vpop.xlane.xlu0 %1200 }
 0x4b8   : > { %2314 = vrcp.f32 %v1201_v28 }
 0x4bb   : > { %v1204_v29 = vpop.xlane.xlu0 %1203  ;;  %v1322_v30 = vpop.xlane.xlu1 %1321 }
 0x4bc   : > { %2316 = vrcp.f32 %v1204_v29 }
 0x4bd   : > { %2318 = vrcp.f32 %v1322_v30 }
 0x4be   : > { %v2607_v14 = vpop.f32.mrf.mxu0 }
 0x4bf   : > { %v1325_v31 = vpop.xlane.xlu0 %1324  ;;  %v958_v52 = vpop.xlane.xlu1 %957 }
 0x4c0   : > { %v2137_v15 = vpop.f32.mrf.mxu0  ;;  %2320 = vrcp.f32 %v1325_v31 }
 0x4c1   : > { %2322 = vrcp.f32 %v958_v52  ;;  %v2281_v52 = vld [vmem:[%s2739_s13 + $0x30] sm:$0xff]  }
 0x4c2   : > { %v1006_v16 = vpop.f32.mrf.mxu0 }
 0x4c3   : > { %v961_v53 = vpop.xlane.xlu0 %960 }
 0x4c4   : > { %v2138_v17 = vpop.f32.mrf.mxu0  ;;  %2324 = vrcp.f32 %v961_v53  ;;  %v2282_v53 = vld [vmem:[%s2739_s13 + $0x28] sm:$0xff]  }
 0x4c5   : > { %v2315_v35 = vpop.eup %2314 }
 0x4c6   : > { %v1125_v18 = vpop.f32.mrf.mxu0 }
 0x4c7   : > { %v1134_v24 = vmul.f32 %v2311_v20, %v1125_v18 }
 0x4c8   : > { %v2149_v19 = vpop.f32.mrf.mxu0 }
 0x4c9   : > { %v2317_v36 = vpop.eup %2316 }
 0x4ca   : > { %v1128_v23 = vpop.f32.mrf.mxu0  ;;  %v2319_v45 = vpop.eup %2318 }
 0x4cb   : > { %v1135_v25 = vmul.f32 %v2313_v21, %v1128_v23 }
 0x4cc   : > { %v2150_v26 = vpop.f32.mrf.mxu0 }
 0x4cd   : > { %v2259_v27 = vpack.i.bf16 %v1135_v25, %v1134_v24  ;;  %v2321_v46 = vpop.eup %2320 }
 0x4ce   : > { %v2323_v55 = vpop.eup %2322 }
 0x4cf   : > { %2260 = vrot.lane.b32.xlu1 %v2259_v27, %s2371_s28  ;;  %v1012_v62 = vmul.f32 %v2323_v55, %v2607_v14  ;;  %v2284_v55 = vld [vmem:[%s2739_s13 + $0x18] sm:$0xff]  }
 0x4d1   : > { %v2325_v57 = vpop.eup %2324 }
 0x4d2   : > { %v1013_v63 = vmul.f32 %v2325_v57, %v1006_v16  ;;  %v2286_v57 = vld [vmem:[%s2739_s13 + $0x8] sm:$0xff]  }
 0x4ef   : > { %v1246_v33 = vpop.f32.mrf.mxu0 }
 0x4f0   : > { %v1255_v38 = vmul.f32 %v2315_v35, %v1246_v33  ;;  %v2279_v33 = vld [vmem:[%s2737_s11] sm:$0xff]  }
 0x4f1   : > { %v2161_v34 = vpop.f32.mrf.mxu0  ;;  %2186 = vmatpush3.bf16.msra.mxu0 %v2279_v33 }
 0x4f2   : > { %2211 = vmatprep.subr.bf16.mxu0 %v2358_v22 }
 0x4f3   : > { %v1249_v37 = vpop.f32.mrf.mxu0 }
 0x4f4   : > { %v1256_v39 = vmul.f32 %v2317_v36, %v1249_v37 }
 0x4f5   : > { %v2162_v41 = vpop.f32.mrf.mxu0 }
 0x4f6   : > { %v2264_v42 = vpack.i.bf16 %v1256_v39, %v1255_v38 }
 0x4f7   : > { %v1367_v43 = vpop.f32.mrf.mxu0 }
 0x4f8   : > { %2265 = vrot.lane.b32.xlu0 %v2264_v42, %s2372_s19  ;;  %v1376_v48 = vmul.f32 %v2319_v45, %v1367_v43  ;;  %v2060_v42 = vld [vmem:[%s2735_s9] ss:$0 sm:$0xff] }
 0x4f9   : > { %v2173_v44 = vpop.f32.mrf.mxu0 }
 0x4fb   : > { %v1370_v47 = vpop.f32.mrf.mxu0 }
 0x4fc   : > { %v1377_v49 = vmul.f32 %v2321_v46, %v1370_v47  ;;  %v2061_v46 = vld [vmem:[%s2736_s10] ss:$0 sm:$0xff] }
 0x4fd   : > { %v2174_v50 = vpop.f32.mrf.mxu0 }
 0x4fe   : > { %v2269_v51 = vpack.i.bf16 %v1377_v49, %v1376_v48 }
 0x500   : > { %2270 = vrot.lane.b32.xlu1 %v2269_v51, %s2373_s1  ;;  %v2280_v51 = vld [vmem:[%s2739_s13 + $0x38] sm:$0xff]  }
 0x541   : > { %v2261_v54 = vpop.permute.xlu1 %2260 }
 0x542   : > { %v2263_v58 = vunpack.i.h.bf16 %v2261_v54  ;;  %v2262_v59 = vunpack.i.l.bf16 %v2261_v54  ;;  %v2283_v54 = vld [vmem:[%s2739_s13 + $0x20] sm:$0xff]  }
 0x544   : > { %v1403_v1 = vsel %vm895_vm3, %v1013_v63, %v2263_v58  ;;  %v1402_v2 = vsel %vm895_vm3, %v1012_v62, %v2262_v59  ;;  %v2287_v58 = vld [vmem:[%s2739_s13] sm:$0xff]  }
 0x545   : > { %v2062_v59 = vld [vmem:[%s2738_s12] ss:$0 sm:$0xff] }
 0x56a   : > { %v2266_v56 = vpop.permute.xlu0 %2265 }
 0x56b   : > { %v2268_v60 = vunpack.i.h.bf16 %v2266_v56  ;;  %v2267_v61 = vunpack.i.l.bf16 %v2266_v56  ;;  %v2285_v56 = vld [vmem:[%s2739_s13 + $0x10] sm:$0xff]  }
 0x56d   : > { %v1405_v5 = vsel %vm943_vm4, %v1403_v1, %v2268_v60  ;;  %v1404_v6 = vsel %vm943_vm4, %v1402_v2, %v2267_v61 }
 0x572   : > { %v2271_v0 = vpop.permute.xlu1 %2270 }
 0x573   : > { %v2273_v3 = vunpack.i.h.bf16 %v2271_v0  ;;  %v2272_v4 = vunpack.i.l.bf16 %v2271_v0 }
 0x575   : > { %v1408_v9 = vsel %vm1406_vm5, %v1405_v5, %v2273_v3  ;;  %v1407_v10 = vsel %vm1406_vm5, %v1404_v6, %v2272_v4 }
 0x576   : > { %v1413_v11 = vpack.c.bf16 %v1408_v9, %v1407_v10 }
 0x578   : > { %2180 = vmatmul.mubr.msk.bf16.vlgmr.msra.gmra.mxu1 %vm769_vm1, %v1413_v11 }
 0x579   : > { %2207 = vmatprep.mubr.msk.bf16.mxu1 %vm2359_vm2, %v2358_v22  ;;  %2192 = vmatpush3.bf16.msra.mxu1 %v2280_v51 }
 0x57a   : > { %2193 = vmatprep.subr.bf16.mxu1 %v2358_v22 }
 0x57d   : > { %2194 = vmatpush3.bf16.msra.mxu1 %v2281_v52 }
 0x57e   : > { %2195 = vmatprep.subr.bf16.mxu1 %v2358_v22 }
 0x581   : > { %2196 = vmatpush3.bf16.msra.mxu1 %v2282_v53 }
 0x582   : > { %2197 = vmatprep.subr.bf16.mxu1 %v2358_v22 }
 0x585   : > { %2198 = vmatpush3.bf16.msra.mxu1 %v2283_v54 }
 0x586   : > { %2199 = vmatprep.subr.bf16.mxu1 %v2358_v22 }
 0x589   : > { %2200 = vmatpush3.bf16.msra.mxu1 %v2284_v55 }
 0x58a   : > { %2201 = vmatprep.subr.bf16.mxu1 %v2358_v22 }
 0x58d   : > { %2202 = vmatpush3.bf16.msra.mxu1 %v2285_v56 }
 0x58e   : > { %2203 = vmatprep.subr.bf16.mxu1 %v2358_v22 }
 0x591   : > { %2204 = vmatpush3.bf16.msra.mxu1 %v2286_v57 }
 0x592   : > { %2205 = vmatprep.subr.bf16.mxu1 %v2358_v22 }
 0x595   : > { %2206 = vmatpush3.bf16.msra.mxu1 %v2287_v58 }
 0x638   : > { %v1470_v13 = vpop.f32.mrf.mxu1 }
 0x639   : > { %v1471_v14 = vadd.f32 %v2056_v12, %v1470_v13 }
 0x63a   : > { %v2181_v15 = vpop.f32.mrf.mxu1 }
 0x63b   : > { %v2629_v16 = vadd.f32 %v1471_v14, %v2499_v7 }
 0x63c   : > { %v1473_v17 = vpop.f32.mrf.mxu1 }
 0x63d   : > { %v1474_v18 = vadd.f32 %v2056_v12, %v1473_v17  ;;  %v1481_v19 = vsel %vm769_vm1, %v2629_v16, 0.0 }
 0x63e   : > { %1482 = vadd.xlane.f32.xlu1 %v1481_v19  ;;  %v2182_v20 = vpop.f32.mrf.mxu1 }
 0x63f   : > { %v2634_v21 = vadd.f32 %v1474_v18, %v2501_v8 }
 0x641   : > { %v1484_v23 = vsel %vm769_vm1, %v2634_v21, 0.0 }
 0x642   : > { %1485 = vadd.xlane.f32.xlu0 %v1484_v23 }
 0x6c7   : > { %v1483_v24 = vpop.xlane.xlu1 %1482 }
 0x6c8   : > { %v1487_v25 = vmul.f32 0.03125, %v1483_v24 }
 0x6ca   : > { %v1489_v26 = vsub.f32 %v2629_v16, %v1487_v25 }
 0x6cb   : > { %v1486_v7 = vpop.xlane.xlu0 %1485 }
 0x6cc   : > { %v1488_v27 = vmul.f32 0.03125, %v1486_v7  ;;  %v1491_v28 = vmul.f32 %v1489_v26, %v1489_v26  ;;  %v2289_v7 = vld [vmem:[%s2741_s15] sm:$0xff]  }
 0x6ce   : > { %v1490_v29 = vsub.f32 %v2634_v21, %v1488_v27  ;;  %v1493_v30 = vsel %vm769_vm1, %v1491_v28, 0.0  ;;  %v2066_v27 = vld [vmem:[%s2740_s14] ss:$0 sm:$0xff] }
 0x6cf   : > { %1494 = vadd.xlane.f32.xlu0 %v1493_v30 }
 0x6d0   : > { %v1492_v31 = vmul.f32 %v1490_v29, %v1490_v29 }
 0x6d2   : > { %v1496_v8 = vsel %vm769_vm1, %v1492_v31, 0.0 }
 0x6d3   : > { %1497 = vadd.xlane.f32.xlu1 %v1496_v8 }
 0x758   : > { %v1495_v34 = vpop.xlane.xlu0 %1494 }
 0x759   : > { %v1499_v35 = vmul.f32 0.03125, %v1495_v34 }
 0x75b   : > { %v1501_v36 = vadd.f32 1e-05, %v1499_v35 }
 0x75c   : > { %v1498_v37 = vpop.xlane.xlu1 %1497 }
 0x75d   : > { %2326 = vrsqrt.f32 %v1501_v36  ;;  %v1500_v38 = vmul.f32 0.03125, %v1498_v37  ;;  %v2075_v37 = vld [vmem:[%s2742_s16] ss:$0 sm:$0xff] }
 0x75f   : > { %v1502_v39 = vadd.f32 1e-05, %v1500_v38 }
 0x761   : > { %2328 = vrsqrt.f32 %v1502_v39 }
 0x76a   : > { %v2327_v40 = vpop.eup %2326 }
 0x76b   : > { %v1505_v41 = vmul.f32 %v2327_v40, %v1489_v26  ;;  %v2288_v26 = vld [vmem:[%s2741_s15 + $0x8] sm:$0xff]  }
 0x76d   : > { %v1513_v45 = vmul.f32 %v2060_v42, %v1505_v41 }
 0x76e   : > { %v2329_v43 = vpop.eup %2328 }
 0x76f   : > { %v1506_v44 = vmul.f32 %v2329_v43, %v1490_v29  ;;  %v1521_v48 = vadd.f32 %v2061_v46, %v1513_v45 }
 0x771   : > { %v1514_v47 = vmul.f32 %v2060_v42, %v1506_v44 }
 0x773   : > { %v1522_v49 = vadd.f32 %v2061_v46, %v1514_v47 }
 0x775   : > { %v1527_v50 = vpack.c.bf16 %v1522_v49, %v1521_v48 }
 0x777   : > { %2188 = vmatmul.mubr.msk.bf16.vlgmr.msra.gmra.mxu0 %vm769_vm1, %v1527_v50 }
 0x778   : > { %2215 = vmatprep.mubr.msk.bf16.mxu0 %vm2359_vm2, %v2358_v22  ;;  %2212 = vmatpush3.bf16.msra.mxu0 %v2288_v26 }
 0x779   : > { %2213 = vmatprep.subr.bf16.mxu0 %v2358_v22 }
 0x77c   : > { %2214 = vmatpush3.bf16.msra.mxu0 %v2289_v7 }
 0x837   : > { %v1584_v60 = vpop.f32.mrf.mxu0 }
 0x838   : > { %v1585_v61 = vadd.f32 %v2062_v59, %v1584_v60 }
 0x839   : > { %v2189_v62 = vpop.f32.mrf.mxu0 }
 0x83a   : > { %v1591_v63 = vmul.f32 %v1585_v61, %v1585_v61 }
 0x83b   : > { %v1587_v0 = vpop.f32.mrf.mxu0 }
 0x83c   : > { %v1593_v1 = vmul.f32 %v1591_v63, %v1585_v61  ;;  %v1588_v2 = vadd.f32 %v2062_v59, %v1587_v0 }
 0x83d   : > { %v2190_v3 = vpop.f32.mrf.mxu0 }
 0x83e   : > { %v1595_v4 = vmul.f32 0.044715, %v1593_v1  ;;  %v1592_v5 = vmul.f32 %v1588_v2, %v1588_v2 }
 0x840   : > { %v1597_v6 = vadd.f32 %v1595_v4, %v1585_v61  ;;  %v1594_v9 = vmul.f32 %v1592_v5, %v1588_v2 }
 0x842   : > { %v1599_v10 = vmul.f32 0.7978846, %v1597_v6  ;;  %v1596_v11 = vmul.f32 0.044715, %v1594_v9 }
 0x844   : > { %2330 = vtanh.f32 %v1599_v10  ;;  %v1598_v12 = vadd.f32 %v1596_v11, %v1588_v2 }
 0x846   : > { %v1600_v13 = vmul.f32 0.7978846, %v1598_v12 }
 0x848   : > { %2332 = vtanh.f32 %v1600_v13 }
 0x851   : > { %v2331_v14 = vpop.eup %2330 }
 0x852   : > { %v1603_v15 = vadd.f32 1.0, %v2331_v14 }
 0x854   : > { %v1605_v18 = vmul.f32 0.5, %v1603_v15 }
 0x855   : > { %v2333_v17 = vpop.eup %2332 }
 0x856   : > { %v1604_v19 = vadd.f32 1.0, %v2333_v17  ;;  %v1607_v23 = vmul.f32 %v1605_v18, %v1585_v61 }
 0x858   : > { %v1606_v20 = vmul.f32 0.5, %v1604_v19 }
 0x85a   : > { %v1608_v24 = vmul.f32 %v1606_v20, %v1588_v2 }
 0x85c   : > { %v1625_v25 = vpack.c.bf16 %v1608_v24, %v1607_v23 }
 0x85e   : > { %2208 = vmatmul.mubr.bf16.vlgmr.msra.gmra.mxu1 %v1625_v25 }
 0x91e   : > { %v1715_v28 = vpop.f32.mrf.mxu1 }
 0x91f   : > { %v1716_v29 = vadd.f32 %v2066_v27, %v1715_v28 }
 0x920   : > { %v2209_v30 = vpop.f32.mrf.mxu1 }
 0x921   : > { %v1722_v31 = vadd.f32 %v1716_v29, %v2629_v16 }
 0x922   : > { %v1718_v8 = vpop.f32.mrf.mxu1 }
 0x923   : > { %1724 = vst.msk [vmem:[#allocation2] sm:$0xff] %vm769_vm1, %v1722_v31  ;;  %v1719_v32 = vadd.f32 %v2066_v27, %v1718_v8 }
 0x924   : > { %v2210_v33 = vpop.f32.mrf.mxu1 }
 0x925   : > { %v1723_v34 = vadd.f32 %v1719_v32, %v2634_v21 }
 0x927   : > { %1725 = vst.msk [vmem:[#allocation2 + $0x8] sm:$0xff] %vm769_vm1, %v1723_v34 }
 0x92a   : > { %v1729_v22 = vld [vmem:[#allocation2] sm:$0xff] }
 0x92e   : > { %v1730_v35 = vld [vmem:[#allocation2 + $0x8] sm:$0xff] }
 0x92f   : > { %v1735_v36 = vpack.c.bf16 %v1730_v35, %v1729_v22 }
 0x931   : > { %2216 = vmatmul.mubr.msk.bf16.vlgmr.msra.gmra.mxu0 %vm769_vm1, %v1735_v36 }
 0x9f1   : > { %v1792_v16 = vpop.f32.mrf.mxu0 }
 0x9f2   : > { %v1793_v38 = vadd.f32 %v2075_v37, %v1792_v16 }
 0x9f3   : > { %v2217_v39 = vpop.f32.mrf.mxu0 }
 0x9f4   : > { %1799 = vst.msk [vmem:[%s749_s0] sm:$0xff] %vm943_vm4, %v1793_v38 }
 0x9f5   : > { %v1795_v21 = vpop.f32.mrf.mxu0 }
 0x9f6   : > { %v1796_v40 = vadd.f32 %v2075_v37, %v1795_v21 }
 0x9f7   : > { %v2218_v41 = vpop.f32.mrf.mxu0 }
 0x9f8   : > { %1800 = vst.msk [vmem:[%s749_s0 + $0x8] sm:$0xff] %vm943_vm4, %v1796_v40 }
 0x9f9 PF: > { %s27_s26 = sadd.s32 1, %s2356_s26   ;;  %s2748_s24 = smov %s2352_s25 }
 0x9fa   : > { %p24_p5 = scmp.ge.s32.totalorder %s27_s26, 4   ;;  %s2749_s25 = smov %s2751_s27 }
 0x9fc   :  { %26 = sbr.rel (!%p24_p5) target bundleno = 3 (0x3), region = 162 }

// kernel: masked_autoencoder_forward.2
= control target key start
LH: loop header
LB: loop body
LE: loop exit
PB: predicated region body
PF: predicated region fallthrough
CT: control target
= control target key end

     0   :  { %s2263_s21 = smov 0   ;;  %s2265_s22 = smov 0   ;;  %s2542_s0 = inlined_call_operand.vmem [shape: f32[2,4,16], index: 0, kind: input, shape index: {}]   ;;  %s2543_s1 = inlined_call_operand.vmem [shape: bf16[16,32], index: 1, kind: input, shape index: {}]   ;;  %s2544_s2 = inlined_call_operand.vmem [shape: f32[1,32], index: 2, kind: input, shape index: {}]   ;;  %s2545_s3 = inlined_call_operand.vmem [shape: f32[4,32], index: 3, kind: input, shape index: {}]   ;;  %s2546_s4 = inlined_call_operand.vmem [shape: f32[2,1,32], index: 4, kind: input, shape index: {}]   ;;  %s2547_s5 = inlined_call_operand.vmem [shape: f32[2,1,32], index: 5, kind: input, shape index: {}]   ;;  %s2548_s6 = inlined_call_operand.vmem [shape: bf16[2,32,96], index: 6, kind: input, shape index: {}]   ;;  %s2549_s7 = inlined_call_operand.vmem [shape: f32[2,1,96], index: 7, kind: input, shape index: {}]   ;;  %s2550_s8 = inlined_call_operand.vmem [shape: bf16[2,32,32], index: 8, kind: input, shape index: {}]   ;;  %s2551_s9 = inlined_call_operand.vmem [shape: f32[2,1,32], index: 9, kind: input, shape index: {}]   ;;  %s2552_s10 = inlined_call_operand.vmem [shape: f32[2,1,32], index: 10, kind: input, shape index: {}]   ;;  %s2553_s11 = inlined_call_operand.vmem [shape: f32[2,1,32], index: 11, kind: input, shape index: {}]   ;;  %s2554_s12 = inlined_call_operand.vmem [shape: bf16[2,32,128], index: 12, kind: input, shape index: {}]   ;;  %s2555_s13 = inlined_call_operand.vmem [shape: f32[2,1,128], index: 13, kind: input, shape index: {}]   ;;  %s2556_s14 = inlined_call_operand.vmem [shape: bf16[2,128,32], index: 14, kind: input, shape index: {}]   ;;  %s2557_s15 = inlined_call_operand.vmem [shape: f32[2,1,32], index: 15, kind: input, shape index: {}]   ;;  %s2558_s16 = inlined_call_operand.vmem [shape: f32[2,4,32], index: 16, kind: output, shape index: {}]  }
   0x1   :  { %2563 = sst [smem:[#allocation9_spill]] %s2542_s0  ;;  %s2267_s23 = smov 0  }
   0x2   :  { %2564 = sst [smem:[#allocation10_spill]] %s2543_s1  ;;  %s2269_s24 = smov 0  }
   0x3   :  { %2565 = sst [smem:[#allocation11_spill]] %s2544_s2  ;;  %s2271_s25 = smov 0  }
   0x4   :  { %2566 = sst [smem:[#allocation12_spill]] %s2545_s3 }
   0x5   :  { %2567 = sst [smem:[#allocation13_spill]] %s2547_s5 }
   0x6   :  { %2568 = sst [smem:[#allocation14_spill]] %s2548_s6 }
   0x7   :  { %2569 = sst [smem:[#allocation15_spill]] %s2550_s8 }
   0x8   :  { %2570 = sst [smem:[#allocation16_spill]] %s2558_s16 }
   0x9 LB: > { %2571 = sst [smem:[#allocation3_spill]] %s2142_s21  ;;  %s35_s26 = sadd.s32 1, %s2150_s23  ;;  %s2158_s25 = sphi %s2271_s25, %s26_s25   ;;  %s2154_s24 = sphi %s2269_s24, %s2598_s24   ;;  %s2150_s23 = sphi %s2267_s23, %s2597_s23   ;;  %s2146_s22 = sphi %s2265_s22, %s2596_s22   ;;  %s2142_s21 = sphi %s2263_s21, %s2595_s21  }
   0xa   : > { %2572 = sst [smem:[#allocation4_spill]] %s2150_s23  ;;  %s38_s27 = sadd.s32 1, %s2154_s24 }
   0xb   : > { %2573 = sst [smem:[#allocation5_spill]] %s2154_s24  ;;  %p36_p0 = scmp.ge.s32.totalorder %s35_s26, 2 }
   0xc   : > { %2574 = sst [smem:[#allocation6_spill]] %s2158_s25  ;;  %p1836_p1 = scmp.ge.s32.totalorder %s2158_s25, 1 }
   0xd   : > { %p577_p2 = scmp.lt.s32.totalorder %s2158_s25, 5  ;;  %s2600_s26 = smov (%p36_p0, %s35_s26), 0 }
   0xe   : > { %2575 = sst [smem:[#allocation7_spill]] %s2600_s26  ;;  %s2602_s27 = smov (!%p36_p0, %s38_s27), %s2154_s24 }
   0xf   : > { %p578_p3 = pnand %p1836_p1, %p577_p2  ;;  %p40_p4 = scmp.ge.s32.totalorder %s2602_s27, 2 }
  0x10   : > { %p669_p5 = scmp.lt.s32.totalorder (!%p578_p3), %s2146_s22, 1  ;;  %p673_p6 = scmp.lt.s32.totalorder (!%p578_p3), %s2142_s21, 1 }
  0x11   : > { %s2604_s27 = smov (%p40_p4, %s2602_s27), 0  ;;  %581 = sbr.rel (%p578_p3) target bundleno = 2549 (0x9f5), region = 84 }
  0x12   : > { %2576 = sst [smem:[#allocation8_spill]] %s2604_s27 }
  0x13   : > { %s2577_s17 = sld [smem:[#allocation9_spill]] (!%p578_p3) }
  0x14   : > { %s2579_s6 = sld [smem:[#allocation14_spill]] (!%p578_p3) }
  0x15   : > { %s2580_s8 = sld [smem:[#allocation15_spill]] (!%p578_p3) }
  0x16   : > { %s2606_s22 = smov (!%p669_p5, %s2146_s22), 1 }
  0x17   : > { %s2297_s28 = scalar_select %p673_p6, %s2142_s21, 1 }
  0x18   : > { %s1837_s29 = sshll.u32 %s2606_s22, 2 }
  0x19   : > { %s672_s18 = scalar_lea.vmem %s2577_s17, %s1837_s29  ;;  %s1887_s25 = sshll.u32 %s2297_s28, 4 }
  0x1a   : > { %s2314_s1 = scalar_lea.vmem %s2579_s6, %s1887_s25  ;;  %s2340_s22 = scalar_lea.vmem %s2554_s12, %s1887_s25 }
  0x1b   : > { %s2323_s17 = scalar_lea.vmem %s2580_s8, %s1887_s25  ;;  %s708_s16 = scalar_lea.vmem %s2555_s13, %s2297_s28 }
  0x1c   : > { %s1890_s8 = sshll.u32 %s2297_s28, 6  ;;  %s716_s24 = scalar_lea.vmem %s2557_s15, %s2297_s28 }
  0x1d   : > { %s2354_s27 = scalar_lea.vmem %s2556_s14, %s1890_s8  ;;  %s2581_s6 = sld [smem:[#allocation16_spill]] }
  0x1e   : > { %s2582_s25 = sld [smem:[#allocation3_spill]] }
  0x23   : > { %s2359_s5 = scalar_lea.vmem %s2581_s6, %s1837_s29 }
  0x24   : > { %p1847_p7 = scmp.ne.s32.totalorder %s2582_s25, 0 }
  0x25   : > { %s2583_s0 = sld [smem:[#allocation10_spill]] (!%p1847_p7) }
  0x26   : > { %725 = sbr.rel (%p1847_p7) target bundleno = 247 (0xf7), region = 88  ;;  %s2584_s6 = sld [smem:[#allocation11_spill]] (!%p1847_p7) }
  0x27   : > { %s2585_s23 = sld [smem:[#allocation12_spill]] (!%p1847_p7) }
  0x2b   : > { %v2083_v0 = vld [vmem:[%s2583_s0] sm:$0xff]   ;;  %v2160_v1 = vmov 0.0   ;;  %vm2161_vm0 = vmmov 0   ;;  %vm743_vm1 = vcmask 130048   ;;  %vm789_vm2 = vcmask 257024  }
  0x2c   : > { %1927 = vmatprep.subr.bf16.mxu0 %v2160_v1  ;;  %v726_v2 = vld [vmem:[%s672_s18] sm:$0xf]  ;;  %1929 = vmatprep.mubr.msk.bf16.mxu0 %vm2161_vm0, %v2160_v1 }
  0x2d   : > { %1928 = vmatpush3.bf16.msra.mxu0 %v2083_v0  ;;  %v729_v3 = vpack.c.bf16 %v726_v2, %v726_v2  ;;  %v1848_v4 = vld [vmem:[%s2584_s6] ss:$0 sm:$0xff] }
  0x2e   : > { %v787_v6 = vld [vmem:[%s2585_s23] sm:$0xf] }
  0x30   : > { %1930 = vmatmul.mubr.msk.bf16.vlgmr.msra.gmra.mxu0 %vm743_vm1, %v729_v3 }
  0xf0   : > { %v781_v5 = vpop.f32.mrf.mxu0 }
  0xf1   : > { %v782_v7 = vadd.f32 %v1848_v4, %v781_v5 }
  0xf2   : > { %v1931_v8 = vpop.f32.mrf.mxu0 }
  0xf3   : > { %v788_v9 = vadd.f32 %v787_v6, %v782_v7 }
  0xf4   : > { %v784_v10 = vpop.f32.mrf.mxu0 }
  0xf5   : > { %790 = vst.msk [vmem:[#allocation2] sm:$0xf] %vm789_vm2, %v788_v9 }
  0xf6   : > { %v1932_v11 = vpop.f32.mrf.mxu0 }
  0xf7 PF: > { %vm794_vm3 = vcmask 257024   ;;  %v2084_v19 = vld [vmem:[%s2314_s1 + $0x8] sm:$0xff]   ;;  %v2162_v20 = vmov 0.0   ;;  %vm2163_vm4 = vmmov 0   ;;  %v2085_v21 = vld [vmem:[%s2314_s1] sm:$0xff]   ;;  %s2586_s1 = scalar_lea.vmem %s2546_s4, %s2297_s28  ;;  %s2587_s25 = sld [smem:[#allocation13_spill]] }
  0xf8   : > { %1933 = vmatprep.subr.bf16.mxu0 %v2162_v20  ;;  %1937 = vmatprep.mubr.msk.bf16.mxu0 %vm2163_vm4, %v2162_v20  ;;  %v1851_v26 = vld [vmem:[%s2586_s1] ss:$0 sm:$0xff]  ;;  %vm847_vm5 = vcmask 261120   ;;  %s2589_s8 = scalar_lea.vmem %s2549_s7, %s2297_s28  ;;  %s2164_s19 = smov 96   ;;  %vm897_vm6 = vcmask 64512   ;;  %vm944_vm7 = vcmask 27648  }
  0xf9   : > { %1934 = vmatpush3.bf16.msra.mxu0 %v2084_v19  ;;  %1953 = vmatprep.subr.bf16.mxu1 %v2162_v20  ;;  %v1853_v32 = vld [vmem:[%s2589_s8] ss:$0 sm:$0xff]  ;;  %s2165_s6 = smov 120   ;;  %s2166_s29 = smov 88   ;;  %vm961_vm8 = vcmask 1041408   ;;  %vm957_vm9 = vcmask 31744  }
  0xfa   : > { %1935 = vmatprep.subr.bf16.mxu0 %v2162_v20  ;;  %1955 = vmatprep.mubr.msk.bf16.mxu1 %vm2163_vm4, %v2162_v20  ;;  %s2167_s20 = smov 80   ;;  %s2168_s23 = smov 112   ;;  %vm1351_vm10 = vcmask 130048   ;;  %vm1353_vm11 = vcmask 195584  }
  0xfb   : > { %s2169_s18 = smov 72   ;;  %s2170_s26 = smov 104  }
  0xfc   : > { %v2371_v12 = vld [vmem:[#allocation2] sm:$0xf]  ;;  %s2171_s1 = smov 64   ;;  %s2172_s2 = smov 56  }
  0xfd   : > { %v795_v13 = vsel %vm794_vm3, %v2371_v12, 0.0  ;;  %1936 = vmatpush3.bf16.msra.mxu0 %v2085_v21  ;;  %s2588_s21 = scalar_lea.vmem %s2587_s25, %s2297_s28  ;;  %s2173_s3 = smov 48  }
  0xfe   : > { %796 = vadd.xlane.f32.xlu0 %v795_v13  ;;  %1941 = vmatprep.subr.bf16.mxu0 %v2162_v20  ;;  %v1852_v28 = vld [vmem:[%s2588_s21] ss:$0 sm:$0xff]  ;;  %s2174_s25 = smov 40   ;;  %s2175_s21 = smov 8  }
  0xff   : > { %s2176_s30 = smov 16   ;;  %s2177_s0 = smov 24  }
 0x187   : > { %v797_v14 = vpop.xlane.xlu0 %796 }
 0x188   : > { %v799_v15 = vmul.f32 0.03125, %v797_v14 }
 0x18a   : > { %v800_v16 = vsub.f32 %v2371_v12, %v799_v15 }
 0x18c   : > { %v801_v17 = vmul.f32 %v800_v16, %v800_v16 }
 0x18e   : > { %v802_v18 = vsel %vm794_vm3, %v801_v17, 0.0 }
 0x18f   : > { %803 = vadd.xlane.f32.xlu0 %v802_v18 }
 0x218   : > { %v804_v22 = vpop.xlane.xlu0 %803 }
 0x219   : > { %v805_v23 = vmul.f32 0.03125, %v804_v22 }
 0x21b   : > { %v806_v24 = vadd.f32 1e-05, %v805_v23 }
 0x21d   : > { %2098 = vrsqrt.f32 %v806_v24 }
 0x22a   : > { %v2099_v25 = vpop.eup %2098 }
 0x22b   : > { %v808_v27 = vmul.f32 %v2099_v25, %v800_v16 }
 0x22d   : > { %v815_v29 = vmul.f32 %v1851_v26, %v808_v27 }
 0x22f   : > { %v822_v30 = vadd.f32 %v1852_v28, %v815_v29 }
 0x231   : > { %v827_v31 = vpack.c.bf16 %v822_v30, %v822_v30 }
 0x233   : > { %1938 = vmatmul.mubr.msk.bf16.vlgmr.msra.gmra.mxu0 %vm847_vm5, %v827_v31 }
 0x234   : > { %1943 = vmatprep.mubr.msk.bf16.mxu0 %vm2163_vm4, %v2162_v20 }
 0x2f3   : > { %v885_v33 = vpop.f32.mrf.mxu0 }
 0x2f4   : > { %v886_v34 = vadd.f32 %v1853_v32, %v885_v33 }
 0x2f5   : > { %v1939_v35 = vpop.f32.mrf.mxu0 }
 0x2f6   : > { %v891_v36 = vmul.f32 0.35355338, %v886_v34  ;;  %v2405_v37 = vpack.c.bf16 %v886_v34, %v886_v34 }
 0x2f7   : > { %v888_v38 = vpop.f32.mrf.mxu0 }
 0x2f8   : > { %v892_v39 = vpack.c.bf16 %v891_v36, %v891_v36  ;;  %895 = vrot.lane.b32.xlu1 %v2405_v37, %s2164_s19  ;;  %s2590_s19 = scalar_lea.vmem %s2551_s9, %s2297_s28 }
 0x2f9   : > { %v1940_v40 = vpop.f32.mrf.mxu0 }
 0x2fa   : > { %1008 = vrot.lane.b32.xlu0 %v892_v39, %s2165_s6 }
 0x2fc   : > { %1010 = vrot.lane.b32.xlu1 %v2405_v37, %s2166_s29 }
 0x300   : > { %1120 = vrot.lane.b32.xlu1 %v2405_v37, %s2167_s20  ;;  %s2591_s20 = scalar_lea.vmem %s2552_s10, %s2297_s28 }
 0x304   : > { %1118 = vrot.lane.b32.xlu1 %v892_v39, %s2168_s23 }
 0x308   : > { %1230 = vrot.lane.b32.xlu1 %v2405_v37, %s2169_s18 }
 0x30c   : > { %1228 = vrot.lane.b32.xlu1 %v892_v39, %s2170_s26 }
 0x36a   : > { %v896_v41 = vpop.permute.xlu1 %895 }
 0x36b   : > { %v902_v42 = vsel %vm897_vm6, %v896_v41, 0 }
 0x36c   : > { %1942 = vmatpush3.bf16.xpose.msra.mxu0 %v902_v42  ;;  %v1009_v46 = vpop.permute.xlu0 %1008 }
 0x36d   : > { %1947 = vmatprep.subr.bf16.mxu0 %v2162_v20 }
 0x36e   : > { %v1011_v43 = vpop.permute.xlu1 %1010 }
 0x36f   : > { %v1016_v44 = vsel %vm897_vm6, %v1011_v43, 0 }
 0x370   : > { %1954 = vmatpush3.bf16.xpose.msra.mxu1 %v1016_v44 }
 0x371   : > { %1965 = vmatprep.subr.bf16.mxu1 %v2162_v20 }
 0x372   : > { %v1121_v45 = vpop.permute.xlu1 %1120 }
 0x373   : > { %1944 = vmatmul.mubr.msk.bf16.vlgmr.msra.gmra.mxu0 %vm897_vm6, %v892_v39  ;;  %v1126_v48 = vsel %vm897_vm6, %v1121_v45, 0 }
 0x374   : > { %1949 = vmatprep.mubr.msk.bf16.mxu0 %vm2163_vm4, %v2162_v20 }
 0x376   : > { %v1119_v47 = vpop.permute.xlu1 %1118 }
 0x377   : > { %1956 = vmatmul.mubr.msk.bf16.vlgmr.msra.gmra.mxu1 %vm897_vm6, %v1009_v46 }
 0x378   : > { %1966 = vmatpush3.bf16.xpose.msra.mxu1 %v1126_v48  ;;  %1967 = vmatprep.mubr.msk.bf16.mxu1 %vm2163_vm4, %v2162_v20 }
 0x379   : > { %1977 = vmatprep.subr.bf16.mxu1 %v2162_v20 }
 0x37a   : > { %v1231_v49 = vpop.permute.xlu1 %1230 }
 0x37b   : > { %v1236_v50 = vsel %vm897_vm6, %v1231_v49, 0 }
 0x37e   : > { %v1229_v51 = vpop.permute.xlu1 %1228 }
 0x37f   : > { %1968 = vmatmul.mubr.msk.bf16.vlgmr.msra.gmra.mxu1 %vm897_vm6, %v1119_v47 }
 0x380   : > { %1978 = vmatpush3.bf16.xpose.msra.mxu1 %v1236_v50  ;;  %1979 = vmatprep.mubr.msk.bf16.mxu1 %vm2163_vm4, %v2162_v20 }
 0x381   : > { %1989 = vmatprep.subr.bf16.mxu1 %v2162_v20 }
 0x387   : > { %1980 = vmatmul.mubr.msk.bf16.vlgmr.msra.gmra.mxu1 %vm897_vm6, %v1229_v51 }
 0x388   : > { %1993 = vmatprep.mubr.msk.bf16.mxu1 %vm2163_vm4, %v2162_v20 }
 0x433   : > { %v938_v52 = vpop.f32.mrf.mxu0 }
 0x434   : > { %v945_v53 = vsel %vm944_vm7, %v938_v52, -inf }
 0x435   : > { %946 = vmax.xlane.f32.xlu1 %v945_v53  ;;  %v1945_v54 = vpop.f32.mrf.mxu0 }
 0x436   : > { %v2086_v54 = vld [vmem:[%s2323_s17 + $0x8] sm:$0xff]  }
 0x437   : > { %v941_v55 = vpop.f32.mrf.mxu0  ;;  %v1052_v56 = vpop.f32.mrf.mxu1  ;;  %1990 = vmatpush3.bf16.msra.mxu1 %v2086_v54 }
 0x438   : > { %v1058_v57 = vsel %vm944_vm7, %v1052_v56, -inf  ;;  %1991 = vmatprep.subr.bf16.mxu1 %v2162_v20 }
 0x439   : > { %1059 = vmax.xlane.f32.xlu0 %v1058_v57  ;;  %v1946_v58 = vpop.f32.mrf.mxu0  ;;  %v1957_v59 = vpop.f32.mrf.mxu1 }
 0x43b   : > { %v1055_v60 = vpop.f32.mrf.mxu1 }
 0x43d   : > { %v1958_v61 = vpop.f32.mrf.mxu1 }
 0x43f   : > { %v1162_v62 = vpop.f32.mrf.mxu1 }
 0x440   : > { %v1168_v7 = vsel %vm944_vm7, %v1162_v62, -inf }
 0x441   : > { %v1969_v63 = vpop.f32.mrf.mxu1 }
 0x443   : > { %v1165_v0 = vpop.f32.mrf.mxu1 }
 0x445   : > { %v1970_v1 = vpop.f32.mrf.mxu1 }
 0x446   : > { %955 = vrot.lane.b32.xlu1 %v2405_v37, %s2171_s1 }
 0x447   : > { %v1272_v2 = vpop.f32.mrf.mxu1 }
 0x448   : > { %v1278_v3 = vsel %vm944_vm7, %v1272_v2, -inf }
 0x449   : > { %1279 = vmax.xlane.f32.xlu0 %v1278_v3  ;;  %v1981_v4 = vpop.f32.mrf.mxu1 }
 0x44b   : > { %v1275_v5 = vpop.f32.mrf.mxu1 }
 0x44d   : > { %v1982_v6 = vpop.f32.mrf.mxu1 }
 0x45f   : > { %1068 = vrot.lane.b32.xlu0 %v2405_v37, %s2172_s2  ;;  %s2593_s2 = sld [smem:[#allocation3_spill]] }
 0x465   : > { %p1884_p8 = scmp.ne.s32.totalorder %s2593_s2, 1 }
 0x46a   : > { %1169 = vmax.xlane.f32.xlu1 %v1168_v7 }
 0x47b   : > { %1178 = vrot.lane.b32.xlu1 %v2405_v37, %s2173_s3 }
 0x47f   : > { %1288 = vrot.lane.b32.xlu1 %v2405_v37, %s2174_s25 }
 0x4be   : > { %v947_v8 = vpop.xlane.xlu1 %946 }
 0x4bf   : > { %v948_v9 = vsub.f32 %v938_v52, %v947_v8 }
 0x4c1   : > { %v949_v10 = vmul.f32 1.442695, %v948_v9 }
 0x4c2   : > { %v1060_v11 = vpop.xlane.xlu0 %1059  ;;  %v956_v13 = vpop.permute.xlu1 %955 }
 0x4c3   : > { %2100 = vpow2.f32 %v949_v10  ;;  %v1061_v14 = vsub.f32 %v1052_v56, %v1060_v11  ;;  %v963_v15 = vsel %vm961_vm8, %v956_v13, 0  ;;  %v2087_v56 = vld [vmem:[%s2323_s17] sm:$0xff]  }
 0x4c4   : > { %1948 = vmatpush3.bf16.msra.mxu0 %v963_v15  ;;  %1992 = vmatpush3.bf16.msra.mxu1 %v2087_v56 }
 0x4c5   : > { %v1062_v16 = vmul.f32 1.442695, %v1061_v14  ;;  %1959 = vmatprep.subr.bf16.mxu0 %v2162_v20  ;;  %2005 = vmatprep.subr.bf16.mxu1 %v2162_v20 }
 0x4c7   : > { %2102 = vpow2.f32 %v1062_v16  ;;  %v1865_v16 = vld [vmem:[%s2590_s19] ss:$0 sm:$0xff] }
 0x4d0   : > { %v2101_v17 = vpop.eup %2100 }
 0x4d1   : > { %v954_v18 = vpack.c.bf16 %v2101_v17, %v2101_v17  ;;  %v951_v30 = vsel %vm944_vm7, %v2101_v17, 0.0 }
 0x4d2   : > { %v1280_v19 = vpop.xlane.xlu0 %1279 }
 0x4d3   : > { %v1281_v21 = vsub.f32 %v1272_v2, %v1280_v19  ;;  %1950 = vmatmul.mubr.msk.bf16.vlgmr.msra.gmra.mxu0 %vm957_vm9, %v954_v18 }
 0x4d4   : > { %v2103_v22 = vpop.eup %2102  ;;  %1961 = vmatprep.mubr.msk.bf16.mxu0 %vm2163_vm4, %v2162_v20 }
 0x4d5   : > { %v1282_v23 = vmul.f32 1.442695, %v1281_v21  ;;  %v1064_v24 = vsel %vm944_vm7, %v2103_v22, 0.0  ;;  %v1067_v27 = vpack.c.bf16 %v2103_v22, %v2103_v22 }
 0x4d6   : > { %1065 = vadd.xlane.f32.xlu0 %v1064_v24  ;;  %v1069_v25 = vpop.permute.xlu0 %1068 }
 0x4d7   : > { %2104 = vpow2.f32 %v1282_v23  ;;  %v1074_v26 = vsel %vm961_vm8, %v1069_v25, 0 }
 0x4d8   : > { %1960 = vmatpush3.bf16.msra.mxu0 %v1074_v26 }
 0x4d9   : > { %1971 = vmatprep.subr.bf16.mxu0 %v2162_v20 }
 0x4db   : > { %1962 = vmatmul.mubr.msk.bf16.vlgmr.msra.gmra.mxu0 %vm957_vm9, %v1067_v27 }
 0x4dc   : > { %1973 = vmatprep.mubr.msk.bf16.mxu0 %vm2163_vm4, %v2162_v20 }
 0x4e4   : > { %v2105_v28 = vpop.eup %2104 }
 0x4e5   : > { %v1284_v29 = vsel %vm944_vm7, %v2105_v28, 0.0  ;;  %v1287_v41 = vpack.c.bf16 %v2105_v28, %v2105_v28 }
 0x4e6   : > { %1285 = vadd.xlane.f32.xlu0 %v1284_v29 }
 0x4ea   : > { %952 = vadd.xlane.f32.xlu0 %v951_v30  ;;  %v2088_v30 = vld [vmem:[%s2340_s22 + $0x8] sm:$0xff]  }
 0x4f3   : > { %v1170_v31 = vpop.xlane.xlu1 %1169 }
 0x4f4   : > { %v1171_v32 = vsub.f32 %v1162_v62, %v1170_v31 }
 0x4f6   : > { %v1172_v33 = vmul.f32 1.442695, %v1171_v32 }
 0x4f7   : > { %v1179_v34 = vpop.permute.xlu1 %1178 }
 0x4f8   : > { %2106 = vpow2.f32 %v1172_v33  ;;  %v1184_v35 = vsel %vm961_vm8, %v1179_v34, 0 }
 0x4f9   : > { %1972 = vmatpush3.bf16.msra.mxu0 %v1184_v35  ;;  %v1869_v35 = vld [vmem:[%s2591_s20] ss:$0 sm:$0xff] }
 0x4fa   : > { %1983 = vmatprep.subr.bf16.mxu0 %v2162_v20 }
 0x4fb   : > { %v1289_v37 = vpop.permute.xlu1 %1288 }
 0x4fc   : > { %v1294_v40 = vsel %vm961_vm8, %v1289_v37, 0 }
 0x505   : > { %v2107_v36 = vpop.eup %2106 }
 0x506   : > { %v1174_v38 = vsel %vm944_vm7, %v2107_v36, 0.0  ;;  %v1177_v39 = vpack.c.bf16 %v2107_v36, %v2107_v36 }
 0x507   : > { %1175 = vadd.xlane.f32.xlu1 %v1174_v38 }
 0x508   : > { %1974 = vmatmul.mubr.msk.bf16.vlgmr.msra.gmra.mxu0 %vm957_vm9, %v1177_v39 }
 0x509   : > { %1984 = vmatpush3.bf16.msra.mxu0 %v1294_v40  ;;  %1985 = vmatprep.mubr.msk.bf16.mxu0 %vm2163_vm4, %v2162_v20 }
 0x50a   : > { %1997 = vmatprep.subr.bf16.mxu0 %v2162_v20 }
 0x510   : > { %1986 = vmatmul.mubr.msk.bf16.vlgmr.msra.gmra.mxu0 %vm957_vm9, %v1287_v41  ;;  %v2090_v41 = vld [vmem:[%s2354_s27 + $0x38] sm:$0xff]  }
 0x511   : > { %2001 = vmatprep.mubr.msk.bf16.mxu0 %vm2163_vm4, %v2162_v20  ;;  %1998 = vmatpush3.bf16.msra.mxu0 %v2088_v30 }
 0x512   : > { %1999 = vmatprep.subr.bf16.mxu0 %v2162_v20 }
 0x55f   : > { %v1066_v42 = vpop.xlane.xlu0 %1065 }
 0x560   : > { %2108 = vrcp.f32 %v1066_v42  ;;  %v2091_v42 = vld [vmem:[%s2354_s27 + $0x30] sm:$0xff]  }
 0x56d   : > { %v2109_v47 = vpop.eup %2108 }
 0x56f   : > { %v1286_v55 = vpop.xlane.xlu0 %1285 }
 0x573   : > { %v953_v5 = vpop.xlane.xlu0 %952 }
 0x590   : > { %v1176_v53 = vpop.xlane.xlu1 %1175 }
 0x591   : > { %2110 = vrcp.f32 %v1176_v53 }
 0x592   : > { %2112 = vrcp.f32 %v1286_v55 }
 0x593   : > { %v999_v43 = vpop.f32.mrf.mxu0  ;;  %2114 = vrcp.f32 %v953_v5 }
 0x595   : > { %v1951_v44 = vpop.f32.mrf.mxu0 }
 0x596   : > { %v2093_v44 = vld [vmem:[%s2354_s27 + $0x20] sm:$0xff]  }
 0x597   : > { %v1002_v45 = vpop.f32.mrf.mxu0 }
 0x598   : > { %v2094_v45 = vld [vmem:[%s2354_s27 + $0x18] sm:$0xff]  }
 0x599   : > { %v1952_v46 = vpop.f32.mrf.mxu0 }
 0x59a   : > { %v2095_v46 = vld [vmem:[%s2354_s27 + $0x10] sm:$0xff]  }
 0x59b   : > { %v1110_v48 = vpop.f32.mrf.mxu0 }
 0x59c   : > { %v1117_v49 = vmul.f32 %v2109_v47, %v1110_v48  ;;  %v2096_v47 = vld [vmem:[%s2354_s27 + $0x8] sm:$0xff]   ;;  %v2097_v48 = vld [vmem:[%s2354_s27] sm:$0xff]  }
 0x59d   : > { %v1963_v50 = vpop.f32.mrf.mxu0 }
 0x59e   : > { %1339 = vrot.lane.b32.xlu1 %v1117_v49, %s2175_s21  ;;  %v2111_v57 = vpop.eup %2110  ;;  %v1871_v49 = vld [vmem:[%s708_s16] ss:$0 sm:$0xff] }
 0x59f   : > { %v1113_v51 = vpop.f32.mrf.mxu0  ;;  %v2113_v63 = vpop.eup %2112 }
 0x5a0   : > { %v2115_v6 = vpop.eup %2114 }
 0x5a1   : > { %v1964_v52 = vpop.f32.mrf.mxu0  ;;  %v1006_v8 = vmul.f32 %v2115_v6, %v999_v43  ;;  %v2092_v43 = vld [vmem:[%s2354_s27 + $0x28] sm:$0xff]  }
 0x5c8   : > { %v1220_v58 = vpop.f32.mrf.mxu0 }
 0x5c9   : > { %v1227_v59 = vmul.f32 %v2111_v57, %v1220_v58 }
 0x5ca   : > { %v1975_v60 = vpop.f32.mrf.mxu0 }
 0x5cb   : > { %1343 = vrot.lane.b32.xlu0 %v1227_v59, %s2176_s30 }
 0x5cc   : > { %v1223_v61 = vpop.f32.mrf.mxu0 }
 0x5ce   : > { %v1976_v62 = vpop.f32.mrf.mxu0 }
 0x5d0   : > { %v1330_v0 = vpop.f32.mrf.mxu0 }
 0x5d1   : > { %v1337_v1 = vmul.f32 %v2113_v63, %v1330_v0  ;;  %v1875_v0 = vld [vmem:[%s716_s24] ss:$0 sm:$0xff] }
 0x5d2   : > { %v1987_v2 = vpop.f32.mrf.mxu0 }
 0x5d3   : > { %1347 = vrot.lane.b32.xlu1 %v1337_v1, %s2177_s0 }
 0x5d4   : > { %v1333_v3 = vpop.f32.mrf.mxu0 }
 0x5d6   : > { %v1988_v4 = vpop.f32.mrf.mxu0 }
 0x610   : > { %v1340_v7 = vpop.permute.xlu1 %1339 }
 0x611   : > { %v1350_v10 = vsel %vm897_vm6, %v1006_v8, %v1340_v7 }
 0x63d   : > { %v1344_v9 = vpop.permute.xlu0 %1343 }
 0x63e   : > { %v1352_v11 = vsel %vm1351_vm10, %v1350_v10, %v1344_v9 }
 0x645   : > { %v1348_v13 = vpop.permute.xlu1 %1347 }
 0x646   : > { %v1354_v14 = vsel %vm1353_vm11, %v1352_v11, %v1348_v13 }
 0x647   : > { %v1359_v15 = vpack.c.bf16 %v1354_v14, %v1354_v14 }
 0x649   : > { %1994 = vmatmul.mubr.msk.bf16.vlgmr.msra.gmra.mxu1 %vm847_vm5, %v1359_v15 }
 0x64a   : > { %2021 = vmatprep.mubr.msk.bf16.mxu1 %vm2163_vm4, %v2162_v20  ;;  %2006 = vmatpush3.bf16.msra.mxu1 %v2090_v41 }
 0x64b   : > { %2007 = vmatprep.subr.bf16.mxu1 %v2162_v20 }
 0x64e   : > { %2008 = vmatpush3.bf16.msra.mxu1 %v2091_v42 }
 0x64f   : > { %2009 = vmatprep.subr.bf16.mxu1 %v2162_v20 }
 0x652   : > { %2010 = vmatpush3.bf16.msra.mxu1 %v2092_v43 }
 0x653   : > { %2011 = vmatprep.subr.bf16.mxu1 %v2162_v20 }
 0x656   : > { %2012 = vmatpush3.bf16.msra.mxu1 %v2093_v44 }
 0x657   : > { %2013 = vmatprep.subr.bf16.mxu1 %v2162_v20 }
 0x65a   : > { %2014 = vmatpush3.bf16.msra.mxu1 %v2094_v45 }
 0x65b   : > { %2015 = vmatprep.subr.bf16.mxu1 %v2162_v20 }
 0x65e   : > { %2016 = vmatpush3.bf16.msra.mxu1 %v2095_v46 }
 0x65f   : > { %2017 = vmatprep.subr.bf16.mxu1 %v2162_v20 }
 0x662   : > { %2018 = vmatpush3.bf16.msra.mxu1 %v2096_v47 }
 0x663   : > { %2019 = vmatprep.subr.bf16.mxu1 %v2162_v20 }
 0x666   : > { %2020 = vmatpush3.bf16.msra.mxu1 %v2097_v48 }
 0x709   : > { %v1416_v17 = vpop.f32.mrf.mxu1 }
 0x70a   : > { %v1417_v18 = vadd.f32 %v1865_v16, %v1416_v17 }
 0x70b   : > { %v1995_v19 = vpop.f32.mrf.mxu1 }
 0x70c   : > { %v2477_v21 = vadd.f32 %v1417_v18, %v2371_v12  ;;  %v2089_v12 = vld [vmem:[%s2340_s22] sm:$0xff]   ;;  %s2592_s22 = scalar_lea.vmem %s2553_s11, %s2297_s28 }
 0x70d   : > { %v1419_v22 = vpop.f32.mrf.mxu1  ;;  %2000 = vmatpush3.bf16.msra.mxu0 %v2089_v12  ;;  %v1870_v37 = vld [vmem:[%s2592_s22] ss:$0 sm:$0xff] }
 0x70e   : > { %v1425_v23 = vsel %vm794_vm3, %v2477_v21, 0.0 }
 0x70f   : > { %1426 = vadd.xlane.f32.xlu1 %v1425_v23  ;;  %v1996_v24 = vpop.f32.mrf.mxu1 }
 0x798   : > { %v1427_v25 = vpop.xlane.xlu1 %1426 }
 0x799   : > { %v1428_v26 = vmul.f32 0.03125, %v1427_v25 }
 0x79b   : > { %v1429_v27 = vsub.f32 %v2477_v21, %v1428_v26 }
 0x79d   : > { %v1430_v28 = vmul.f32 %v1429_v27, %v1429_v27 }
 0x79f   : > { %v1431_v29 = vsel %vm794_vm3, %v1430_v28, 0.0 }
 0x7a0   : > { %1432 = vadd.xlane.f32.xlu0 %v1431_v29 }
 0x829   : > { %v1433_v31 = vpop.xlane.xlu0 %1432 }
 0x82a   : > { %v1434_v32 = vmul.f32 0.03125, %v1433_v31 }
 0x82c   : > { %v1435_v33 = vadd.f32 1e-05, %v1434_v32 }
 0x82e   : > { %2116 = vrsqrt.f32 %v1435_v33 }
 0x83b   : > { %v2117_v34 = vpop.eup %2116 }
 0x83c   : > { %v1437_v36 = vmul.f32 %v2117_v34, %v1429_v27 }
 0x83e   : > { %v1444_v38 = vmul.f32 %v1869_v35, %v1437_v36 }
 0x840   : > { %v1451_v39 = vadd.f32 %v1870_v37, %v1444_v38 }
 0x842   : > { %v1456_v40 = vpack.c.bf16 %v1451_v39, %v1451_v39 }
 0x844   : > { %2002 = vmatmul.mubr.msk.bf16.vlgmr.msra.gmra.mxu0 %vm847_vm5, %v1456_v40 }
 0x904   : > { %v1513_v50 = vpop.f32.mrf.mxu0 }
 0x905   : > { %v1514_v51 = vadd.f32 %v1871_v49, %v1513_v50 }
 0x906   : > { %v2003_v52 = vpop.f32.mrf.mxu0 }
 0x907   : > { %v1519_v53 = vmul.f32 %v1514_v51, %v1514_v51 }
 0x908   : > { %v1516_v54 = vpop.f32.mrf.mxu0 }
 0x909   : > { %v1520_v55 = vmul.f32 %v1519_v53, %v1514_v51 }
 0x90a   : > { %v2004_v56 = vpop.f32.mrf.mxu0 }
 0x90b   : > { %v1521_v57 = vmul.f32 0.044715, %v1520_v55 }
 0x90d   : > { %v1522_v58 = vadd.f32 %v1521_v57, %v1514_v51 }
 0x90f   : > { %v1523_v59 = vmul.f32 0.7978846, %v1522_v58 }
 0x911   : > { %2118 = vtanh.f32 %v1523_v59 }
 0x91e   : > { %v2119_v60 = vpop.eup %2118 }
 0x91f   : > { %v1525_v20 = vadd.f32 1.0, %v2119_v60 }
 0x921   : > { %v1526_v61 = vmul.f32 0.5, %v1525_v20 }
 0x923   : > { %v1527_v62 = vmul.f32 %v1526_v61, %v1514_v51 }
 0x925   : > { %v1544_v63 = vpack.c.bf16 %v1527_v62, %v1527_v62 }
 0x927   : > { %2022 = vmatmul.mubr.bf16.vlgmr.msra.gmra.mxu1 %v1544_v63 }
 0x9e7   : > { %v1634_v1 = vpop.f32.mrf.mxu1 }
 0x9e8   : > { %v1635_v2 = vadd.f32 %v1875_v0, %v1634_v1 }
 0x9e9   : > { %v2023_v3 = vpop.f32.mrf.mxu1  ;;  %1645 = sbr.rel (%p1884_p8) target bundleno = 2549 (0x9f5), region = 92 }
 0x9ea   : > { %v1640_v4 = vadd.f32 %v1635_v2, %v2477_v21 }
 0x9eb   : > { %v1637_v5 = vpop.f32.mrf.mxu1 }
 0x9ec   : > { %1641 = vst.msk [vmem:[#allocation2] sm:$0xf] %vm794_vm3, %v1640_v4 }
 0x9ed   : > { %v2024_v6 = vpop.f32.mrf.mxu1 }
 0x9f3   : > { %v1646_v7 = vld [vmem:[#allocation2] sm:$0xf] }
 0x9f4   : > { %1647 = vst.msk [vmem:[%s2359_s5] sm:$0xf] %vm794_vm3, %v1646_v7 }
 0x9f5 PF: > { %s2594_s28 = sld [smem:[#allocation6_spill]] }
 0x9f6   : > { %s2595_s21 = sld [smem:[#allocation4_spill]] }
 0x9f7   : > { %s2596_s22 = sld [smem:[#allocation5_spill]] }
 0x9f8   : > { %s2597_s23 = sld [smem:[#allocation7_spill]] }
 0x9f9   : > { %s2598_s24 = sld [smem:[#allocation8_spill]] }
 0x9fb   : > { %s26_s25 = sadd.s32 1, %s2594_s28  }
 0x9fc   : > { %p23_p9 = scmp.ge.s32.totalorder %s26_s25, 6  }
 0x9fe   :  { %25 = sbr.rel (!%p23_p9) target bundleno = 9 (0x9), region = 158 }

</bundles_post_ra>
